<compile_context>
chip_gen: v5e
topology: v5e:2x2
jax: 0.10.0
libtpu: 0.0.40
codegen_flags: <defaults>
</compile_context>

<pallas_src>
import functools

import jax
import jax.numpy as jnp
from jax.experimental import pallas as pl
from jax.experimental.pallas import tpu as pltpu


# ----------------------------- fused Pallas kernel -------------------------- #

def _mha_fused_kernel(x_ref, wqkv_ref, pp_ref, wo_ref, o_ref, *, heads, scale):
    """Fused QKV proj + LayerNorm + MHSA + output Linear for one batch block.

    x_ref:    (Bblk, N, D)      bf16 patch tokens
    wqkv_ref: (D, 3D)           bf16 concatenated Q/K/V proj weights (in, out)
    pp_ref:   (4, 3D)           f32 packed small params:
                                  row 0      : concat q/k/v biases       (3D)
                                  row 1[:D]  : LayerNorm gamma
                                  row 2[:D]  : LayerNorm beta
                                  row 3[:D]  : output-projection bias
    wo_ref:   (heads, dh, D)    bf16 output-proj weight, split by input head
    o_ref:    (Bblk, N, D)      bf16 output
    """
    Bblk, N, D = x_ref.shape
    dh = D // heads
    R = Bblk * N

    # Flatten rows: projection matmuls get M = Bblk*N sublanes.
    x = x_ref[...].reshape(R, D)                                   # bf16

    # ---- fused QKV projection: one wide bf16 MXU matmul, f32 accumulation.
    y = jnp.dot(x, wqkv_ref[...], preferred_element_type=jnp.float32)

    p = pp_ref[...]                                                # (4, 3D) f32
    y = y + p[0:1, :]                                              # qkv bias
    g, beta = p[1:2, :D], p[2:3, :D]                               # LN affine
    bo = p[3:4, :D]                                                # out bias

    def ln(t):                                                     # f32 stats, eps=1e-5
        mu = jnp.mean(t, axis=-1, keepdims=True)
        var = jnp.mean((t - mu) ** 2, axis=-1, keepdims=True)
        return (t - mu) * jax.lax.rsqrt(var + 1e-5) * g + beta

    qn = ln(y[:, :D])
    kn = ln(y[:, D:2 * D])
    vn = ln(y[:, 2 * D:3 * D])

    # ---- attention: heads batched into single dot_generals per batch element.
    # TODO(synk): for the real 256x256 input (large N) the full (heads, N, N)
    #             score block must be replaced by a flash-style KV-tiled
    #             online-softmax loop with per-generation tile sizes
    #             (v7x 64 MiB VMEM vs v5e/v6e 128 MiB).
    for e in range(Bblk):                                          # static, usually 1
        r0 = e * N

        def heads_of(t):   # (R, D) f32 -> (heads, N, dh) bf16, one-time split
            rows = t[r0:r0 + N]
            return jnp.stack(
                [rows[:, h * dh:(h + 1) * dh] for h in range(heads)],
                axis=0).astype(jnp.bfloat16)

        qh, kh, vh = heads_of(qn), heads_of(kn), heads_of(vn)

        # scores: ONE batched dot_general (batch = heads), f32 accumulation;
        # scale applied to f32 scores (matches reference exactly).
        s = jnp.einsum("hqd,hkd->hqk", qh, kh,
                       preferred_element_type=jnp.float32) * scale  # (H, N, N)
        m = jnp.max(s, axis=-1, keepdims=True)
        pr = jnp.exp(s - m)
        pr = pr * pl.reciprocal(jnp.sum(pr, axis=-1, keepdims=True))  # exact

        # PV: ONE batched dot_general, contraction over the KV axis.
        oh = jnp.einsum("hqk,hkd->hqd", pr.astype(jnp.bfloat16), vh,
                        preferred_element_type=jnp.float32)          # (H, N, dh)

        # Output Linear, head-batched:  sum_h oh[h] @ Wo^T[h*dh:(h+1)*dh, :]
        # == (N, D) @ Wo^T  -- avoids any lane-axis repack of the head outputs.
        pj = jnp.einsum("hnd,hdk->hnk", oh.astype(jnp.bfloat16), wo_ref[...],
                        preferred_element_type=jnp.float32)           # (H, N, D)
        out_e = jnp.sum(pj, axis=0) + bo                              # (N, D) f32

        o_ref[e] = out_e.astype(o_ref.dtype)                          # bf16 store


# ------------------------------- wrapper ----------------------------------- #

def multi_head_attention_forward(x, params, *, heads, patch_kernel):
    B, C, H, W = x.shape
    pk = patch_kernel
    # TODO(synk): F.unfold/F.fold silently drop the remainder for H,W not
    #             divisible by patch_kernel (e.g. 256 with pk=7); not handled.
    assert H % pk == 0 and W % pk == 0
    Hp, Wp = H // pk, W // pk
    N = Hp * Wp
    D = C * pk * pk                   # inner_dim == dim * patch_kernel**2
    assert D % heads == 0
    dh = D // heads
    scale = dh ** -0.5

    # ---- glue: patch extraction (stride==kernel conv input; unfold order C,kh,kw)
    patches = (x.reshape(B, C, Hp, pk, Wp, pk)
                .transpose(0, 2, 4, 1, 3, 5)
                .reshape(B, N, D)).astype(jnp.bfloat16)

    # Conv weights (D, C, pk, pk) flattened to (D, D); kernel consumes (in, out).
    wqkv = jnp.concatenate(
        [params["wq"].reshape(D, D).T,
         params["wk"].reshape(D, D).T,
         params["wv"].reshape(D, D).T], axis=1).astype(jnp.bfloat16)   # (D, 3D)

    # Output Linear weight, transposed to (in, out) then split by input head.
    wo_h = params["wo"].T.reshape(heads, dh, D).astype(jnp.bfloat16)

    # Pack the four tiny parameter vectors into one (4, 3D) block (one DMA).
    packed = jnp.zeros((4, 3 * D), jnp.float32)
    packed = packed.at[0, :].set(
        jnp.concatenate([params["bq"], params["bk"], params["bv"]]))
    packed = packed.at[1, :D].set(params["ln_g"])
    packed = packed.at[2, :D].set(params["ln_b"])
    packed = packed.at[3, :D].set(params["bo"])

    # Rows per grid step: amortize the ~0.35us per-step pipeline overhead,
    # but keep >= 2 grid steps when B > 1 so both v7x TensorCores get work.
    bblk = max(1, min(B, max(1, 128 // N)))
    if B > 1:
        bblk = min(bblk, max(1, B // 2))
    while B % bblk:
        bblk -= 1
    grid = (B // bblk,)

    kernel = functools.partial(_mha_fused_kernel, heads=heads, scale=scale)

    out = pl.pallas_call(
        kernel,
        grid=grid,
        in_specs=[
            pl.BlockSpec((bblk, N, D), lambda i: (i, 0, 0)),     # patch tokens
            pl.BlockSpec((D, 3 * D), lambda i: (0, 0)),          # wqkv (resident)
            pl.BlockSpec((4, 3 * D), lambda i: (0, 0)),          # packed params
            pl.BlockSpec((heads, dh, D), lambda i: (0, 0, 0)),   # wo (resident)
        ],
        out_specs=pl.BlockSpec((bblk, N, D), lambda i: (i, 0, 0)),
        out_shape=jax.ShapeDtypeStruct((B, N, D), jnp.bfloat16),
        compiler_params=pltpu.CompilerParams(
            dimension_semantics=("parallel",),                   # megacore on v7x
            vmem_limit_bytes=32 * 1024 * 1024),                  # safe on v5e/v6e/v7x
    )(patches, wqkv, packed, wo_h)

    # ---- glue: unpatch / F.fold (stride == kernel => pure placement)
    y = (out.astype(jnp.float32)
            .reshape(B, Hp, Wp, C, pk, pk)
            .transpose(0, 3, 1, 4, 2, 5)
            .reshape(B, C, H, W))
    return y


# ------------------------- pure-JAX (f32) reference ------------------------- #

def reference_forward(x, params, *, heads, patch_kernel):
    B, C, H, W = x.shape
    pk = patch_kernel
    Hp, Wp = H // pk, W // pk
    N = Hp * Wp
    D = C * pk * pk
    dh = D // heads
    scale = dh ** -0.5

    patches = (x.reshape(B, C, Hp, pk, Wp, pk)
                .transpose(0, 2, 4, 1, 3, 5)
                .reshape(B, N, D))

    def ln(y):
        mu = jnp.mean(y, axis=-1, keepdims=True)
        var = jnp.mean((y - mu) ** 2, axis=-1, keepdims=True)
        return ((y - mu) * jax.lax.rsqrt(var + 1e-5)
                * params["ln_g"] + params["ln_b"])

    def proj(w, b):
        return patches @ w.reshape(D, D).T + b

    q_ = ln(proj(params["wq"], params["bq"]))
    k_ = ln(proj(params["wk"], params["bk"]))
    v_ = ln(proj(params["wv"], params["bv"]))

    def heads_split(t):
        return t.reshape(B, N, heads, dh).transpose(0, 2, 1, 3)

    q, k, v = heads_split(q_), heads_split(k_), heads_split(v_)
    dots = jnp.einsum("bhnd,bhmd->bhnm", q, k) * scale
    attn = jax.nn.softmax(dots, axis=-1)
    out = jnp.einsum("bhnm,bhmd->bhnd", attn, v)
    out = out.transpose(0, 2, 1, 3).reshape(B, N, D)
    out = out @ params["wo"].T + params["bo"]
    return (out.reshape(B, Hp, Wp, C, pk, pk)
               .transpose(0, 3, 1, 4, 2, 5)
               .reshape(B, C, H, W))


# --------------------------------- main ------------------------------------ #

if __name__ == "__main__":
    # Small shapes consistent with the module: dim=4, heads=8, patch_kernel=4
    # (inner_dim = 4*4*4 = 64, divisible by heads), input 2x4x16x16.
    B, C, H, W = 2, 4, 16, 16
    heads, pk = 8, 4
    D = C * pk * pk

    key = jax.random.PRNGKey(0)
    ks = jax.random.split(key, 12)

    params = {
        "wq": 0.05 * jax.random.normal(ks[0], (D, C, pk, pk), jnp.float32),
        "bq": 0.05 * jax.random.normal(ks[1], (D,), jnp.float32),
        "wk": 0.05 * jax.random.normal(ks[2], (D, C, pk, pk), jnp.float32),
        "bk": 0.05 * jax.random.normal(ks[3], (D,), jnp.float32),
        "wv": 0.05 * jax.random.normal(ks[4], (D, C, pk, pk), jnp.float32),
        "bv": 0.05 * jax.random.normal(ks[5], (D,), jnp.float32),
        "ln_g": 1.0 + 0.1 * jax.random.normal(ks[6], (D,), jnp.float32),
        "ln_b": 0.1 * jax.random.normal(ks[7], (D,), jnp.float32),
        "wo": 0.05 * jax.random.normal(ks[8], (D, D), jnp.float32),
        "bo": 0.05 * jax.random.normal(ks[9], (D,), jnp.float32),
    }

    x = jax.random.uniform(ks[10], (B, C, H, W), jnp.float32)

    out = multi_head_attention_forward(x, params, heads=heads, patch_kernel=pk)
    out = jax.block_until_ready(out)

    ref = jax.block_until_ready(
        reference_forward(x, params, heads=heads, patch_kernel=pk))

    assert out.shape == (B, C, H, W)
    # bf16 MXU operands + bf16 output store (f32 accumulation / stats, exact
    # softmax reciprocal) => modest tolerance vs the pure-f32 reference.
    assert jnp.allclose(out, ref, atol=2e-2, rtol=2e-2), "mismatch vs reference"

    print("KERNEL_OK")
</pallas_src>

<mosaic_0001>
module attributes {stable_mosaic.version = 11 : i64} {
  func.func @_mha_fused_kernel(%arg0: i32, %arg1: memref<1x16x64xbf16, #tpu.memory_space<vmem>>, %arg2: memref<64x192xbf16, #tpu.memory_space<vmem>>, %arg3: memref<4x192xf32, #tpu.memory_space<vmem>>, %arg4: memref<8x8x64xbf16, #tpu.memory_space<vmem>>, %arg5: memref<1x16x64xbf16, #tpu.memory_space<vmem>>) attributes {dimension_semantics = [#tpu.dimension_semantics<parallel>], iteration_bounds = array<i64: 2>, scalar_prefetch = 0 : i64, scratch_operands = 0 : i64, tpu.core_type = #tpu.core_type<tc>, window_params = [{transform_indices = @transform_0, window_bounds = array<i64: 1, 16, 64>}, {pipeline_mode = #tpu.pipeline_mode<synchronous>, transform_indices = @transform_1, window_bounds = array<i64: 64, 192>}, {pipeline_mode = #tpu.pipeline_mode<synchronous>, transform_indices = @transform_2, window_bounds = array<i64: 4, 192>}, {pipeline_mode = #tpu.pipeline_mode<synchronous>, transform_indices = @transform_3, window_bounds = array<i64: 8, 8, 64>}, {transform_indices = @transform_4, window_bounds = array<i64: 1, 16, 64>}]} {
    %c0 = arith.constant 0 : index
    %c0_0 = arith.constant 0 : index
    %c0_1 = arith.constant 0 : index
    %0 = vector.load %arg1[%c0, %c0_0, %c0_1] : memref<1x16x64xbf16, #tpu.memory_space<vmem>>, vector<1x16x64xbf16>
    %1 = vector.shape_cast %0 : vector<1x16x64xbf16> to vector<16x64xbf16>
    %c0_2 = arith.constant 0 : index
    %c0_3 = arith.constant 0 : index
    %2 = vector.load %arg2[%c0_2, %c0_3] : memref<64x192xbf16, #tpu.memory_space<vmem>>, vector<64x192xbf16>
    %cst = arith.constant dense<0.000000e+00> : vector<16x192xf32>
    %3 = tpu.matmul %1, %2, %cst {dimension_numbers = #tpu.dot_dimension_numbers<[1], [0], [0], [1], [0, 0, 1, 1], [], []>} : vector<16x64xbf16>, vector<64x192xbf16>, vector<16x192xf32> -> vector<16x192xf32>
    %c0_4 = arith.constant 0 : index
    %c0_5 = arith.constant 0 : index
    %4 = vector.load %arg3[%c0_4, %c0_5] : memref<4x192xf32, #tpu.memory_space<vmem>>, vector<4x192xf32>
    %5 = vector.extract_strided_slice %4 {offsets = [0, 0], sizes = [1, 192], strides = [1, 1]} : vector<4x192xf32> to vector<1x192xf32>
    %6 = vector.broadcast %5 : vector<1x192xf32> to vector<16x192xf32>
    %7 = arith.addf %3, %6 : vector<16x192xf32>
    %8 = vector.extract_strided_slice %4 {offsets = [1, 0], sizes = [1, 64], strides = [1, 1]} : vector<4x192xf32> to vector<1x64xf32>
    %9 = vector.extract_strided_slice %4 {offsets = [2, 0], sizes = [1, 64], strides = [1, 1]} : vector<4x192xf32> to vector<1x64xf32>
    %10 = vector.extract_strided_slice %4 {offsets = [3, 0], sizes = [1, 64], strides = [1, 1]} : vector<4x192xf32> to vector<1x64xf32>
    %11 = vector.extract_strided_slice %7 {offsets = [0, 0], sizes = [16, 64], strides = [1, 1]} : vector<16x192xf32> to vector<16x64xf32>
    %cst_6 = arith.constant dense<0.000000e+00> : vector<16xf32>
    %12 = vector.multi_reduction <add>, %11, %cst_6 [1] : vector<16x64xf32> to vector<16xf32>
    %13 = vector.shape_cast %12 : vector<16xf32> to vector<16x1xf32>
    %cst_7 = arith.constant 6.400000e+01 : f32
    %14 = vector.broadcast %cst_7 : f32 to vector<16x1xf32>
    %15 = arith.divf %13, %14 : vector<16x1xf32>
    %16 = vector.broadcast %15 : vector<16x1xf32> to vector<16x64xf32>
    %17 = arith.subf %11, %16 : vector<16x64xf32>
    %18 = arith.mulf %17, %17 : vector<16x64xf32>
    %cst_8 = arith.constant dense<0.000000e+00> : vector<16xf32>
    %19 = vector.multi_reduction <add>, %18, %cst_8 [1] : vector<16x64xf32> to vector<16xf32>
    %20 = vector.shape_cast %19 : vector<16xf32> to vector<16x1xf32>
    %cst_9 = arith.constant 6.400000e+01 : f32
    %21 = vector.broadcast %cst_9 : f32 to vector<16x1xf32>
    %22 = arith.divf %20, %21 : vector<16x1xf32>
    %23 = vector.broadcast %15 : vector<16x1xf32> to vector<16x64xf32>
    %24 = arith.subf %11, %23 : vector<16x64xf32>
    %cst_10 = arith.constant 9.99999974E-6 : f32
    %25 = vector.broadcast %cst_10 : f32 to vector<16x1xf32>
    %26 = arith.addf %22, %25 : vector<16x1xf32>
    %27 = math.rsqrt %26 : vector<16x1xf32>
    %28 = vector.broadcast %27 : vector<16x1xf32> to vector<16x64xf32>
    %29 = arith.mulf %24, %28 : vector<16x64xf32>
    %30 = vector.broadcast %8 : vector<1x64xf32> to vector<16x64xf32>
    %31 = arith.mulf %29, %30 : vector<16x64xf32>
    %32 = vector.broadcast %9 : vector<1x64xf32> to vector<16x64xf32>
    %33 = arith.addf %31, %32 : vector<16x64xf32>
    %34 = vector.extract_strided_slice %7 {offsets = [0, 64], sizes = [16, 64], strides = [1, 1]} : vector<16x192xf32> to vector<16x64xf32>
    %cst_11 = arith.constant dense<0.000000e+00> : vector<16xf32>
    %35 = vector.multi_reduction <add>, %34, %cst_11 [1] : vector<16x64xf32> to vector<16xf32>
    %36 = vector.shape_cast %35 : vector<16xf32> to vector<16x1xf32>
    %cst_12 = arith.constant 6.400000e+01 : f32
    %37 = vector.broadcast %cst_12 : f32 to vector<16x1xf32>
    %38 = arith.divf %36, %37 : vector<16x1xf32>
    %39 = vector.broadcast %38 : vector<16x1xf32> to vector<16x64xf32>
    %40 = arith.subf %34, %39 : vector<16x64xf32>
    %41 = arith.mulf %40, %40 : vector<16x64xf32>
    %cst_13 = arith.constant dense<0.000000e+00> : vector<16xf32>
    %42 = vector.multi_reduction <add>, %41, %cst_13 [1] : vector<16x64xf32> to vector<16xf32>
    %43 = vector.shape_cast %42 : vector<16xf32> to vector<16x1xf32>
    %cst_14 = arith.constant 6.400000e+01 : f32
    %44 = vector.broadcast %cst_14 : f32 to vector<16x1xf32>
    %45 = arith.divf %43, %44 : vector<16x1xf32>
    %46 = vector.broadcast %38 : vector<16x1xf32> to vector<16x64xf32>
    %47 = arith.subf %34, %46 : vector<16x64xf32>
    %cst_15 = arith.constant 9.99999974E-6 : f32
    %48 = vector.broadcast %cst_15 : f32 to vector<16x1xf32>
    %49 = arith.addf %45, %48 : vector<16x1xf32>
    %50 = math.rsqrt %49 : vector<16x1xf32>
    %51 = vector.broadcast %50 : vector<16x1xf32> to vector<16x64xf32>
    %52 = arith.mulf %47, %51 : vector<16x64xf32>
    %53 = vector.broadcast %8 : vector<1x64xf32> to vector<16x64xf32>
    %54 = arith.mulf %52, %53 : vector<16x64xf32>
    %55 = vector.broadcast %9 : vector<1x64xf32> to vector<16x64xf32>
    %56 = arith.addf %54, %55 : vector<16x64xf32>
    %57 = vector.extract_strided_slice %7 {offsets = [0, 128], sizes = [16, 64], strides = [1, 1]} : vector<16x192xf32> to vector<16x64xf32>
    %cst_16 = arith.constant dense<0.000000e+00> : vector<16xf32>
    %58 = vector.multi_reduction <add>, %57, %cst_16 [1] : vector<16x64xf32> to vector<16xf32>
    %59 = vector.shape_cast %58 : vector<16xf32> to vector<16x1xf32>
    %cst_17 = arith.constant 6.400000e+01 : f32
    %60 = vector.broadcast %cst_17 : f32 to vector<16x1xf32>
    %61 = arith.divf %59, %60 : vector<16x1xf32>
    %62 = vector.broadcast %61 : vector<16x1xf32> to vector<16x64xf32>
    %63 = arith.subf %57, %62 : vector<16x64xf32>
    %64 = arith.mulf %63, %63 : vector<16x64xf32>
    %cst_18 = arith.constant dense<0.000000e+00> : vector<16xf32>
    %65 = vector.multi_reduction <add>, %64, %cst_18 [1] : vector<16x64xf32> to vector<16xf32>
    %66 = vector.shape_cast %65 : vector<16xf32> to vector<16x1xf32>
    %cst_19 = arith.constant 6.400000e+01 : f32
    %67 = vector.broadcast %cst_19 : f32 to vector<16x1xf32>
    %68 = arith.divf %66, %67 : vector<16x1xf32>
    %69 = vector.broadcast %61 : vector<16x1xf32> to vector<16x64xf32>
    %70 = arith.subf %57, %69 : vector<16x64xf32>
    %cst_20 = arith.constant 9.99999974E-6 : f32
    %71 = vector.broadcast %cst_20 : f32 to vector<16x1xf32>
    %72 = arith.addf %68, %71 : vector<16x1xf32>
    %73 = math.rsqrt %72 : vector<16x1xf32>
    %74 = vector.broadcast %73 : vector<16x1xf32> to vector<16x64xf32>
    %75 = arith.mulf %70, %74 : vector<16x64xf32>
    %76 = vector.broadcast %8 : vector<1x64xf32> to vector<16x64xf32>
    %77 = arith.mulf %75, %76 : vector<16x64xf32>
    %78 = vector.broadcast %9 : vector<1x64xf32> to vector<16x64xf32>
    %79 = arith.addf %77, %78 : vector<16x64xf32>
    %80 = vector.extract_strided_slice %33 {offsets = [0, 0], sizes = [16, 8], strides = [1, 1]} : vector<16x64xf32> to vector<16x8xf32>
    %81 = vector.extract_strided_slice %33 {offsets = [0, 8], sizes = [16, 8], strides = [1, 1]} : vector<16x64xf32> to vector<16x8xf32>
    %82 = vector.extract_strided_slice %33 {offsets = [0, 16], sizes = [16, 8], strides = [1, 1]} : vector<16x64xf32> to vector<16x8xf32>
    %83 = vector.extract_strided_slice %33 {offsets = [0, 24], sizes = [16, 8], strides = [1, 1]} : vector<16x64xf32> to vector<16x8xf32>
    %84 = vector.extract_strided_slice %33 {offsets = [0, 32], sizes = [16, 8], strides = [1, 1]} : vector<16x64xf32> to vector<16x8xf32>
    %85 = vector.extract_strided_slice %33 {offsets = [0, 40], sizes = [16, 8], strides = [1, 1]} : vector<16x64xf32> to vector<16x8xf32>
    %86 = vector.extract_strided_slice %33 {offsets = [0, 48], sizes = [16, 8], strides = [1, 1]} : vector<16x64xf32> to vector<16x8xf32>
    %87 = vector.extract_strided_slice %33 {offsets = [0, 56], sizes = [16, 8], strides = [1, 1]} : vector<16x64xf32> to vector<16x8xf32>
    %88 = vector.shape_cast %80 : vector<16x8xf32> to vector<1x16x8xf32>
    %89 = vector.shape_cast %81 : vector<16x8xf32> to vector<1x16x8xf32>
    %90 = vector.shape_cast %82 : vector<16x8xf32> to vector<1x16x8xf32>
    %91 = vector.shape_cast %83 : vector<16x8xf32> to vector<1x16x8xf32>
    %92 = vector.shape_cast %84 : vector<16x8xf32> to vector<1x16x8xf32>
    %93 = vector.shape_cast %85 : vector<16x8xf32> to vector<1x16x8xf32>
    %94 = vector.shape_cast %86 : vector<16x8xf32> to vector<1x16x8xf32>
    %95 = vector.shape_cast %87 : vector<16x8xf32> to vector<1x16x8xf32>
    %96 = tpu.concatenate %88, %89, %90, %91, %92, %93, %94, %95 in 0 : vector<1x16x8xf32>, vector<1x16x8xf32>, vector<1x16x8xf32>, vector<1x16x8xf32>, vector<1x16x8xf32>, vector<1x16x8xf32>, vector<1x16x8xf32>, vector<1x16x8xf32> -> vector<8x16x8xf32>
    %97 = arith.truncf %96 : vector<8x16x8xf32> to vector<8x16x8xbf16>
    %98 = vector.extract_strided_slice %56 {offsets = [0, 0], sizes = [16, 8], strides = [1, 1]} : vector<16x64xf32> to vector<16x8xf32>
    %99 = vector.extract_strided_slice %56 {offsets = [0, 8], sizes = [16, 8], strides = [1, 1]} : vector<16x64xf32> to vector<16x8xf32>
    %100 = vector.extract_strided_slice %56 {offsets = [0, 16], sizes = [16, 8], strides = [1, 1]} : vector<16x64xf32> to vector<16x8xf32>
    %101 = vector.extract_strided_slice %56 {offsets = [0, 24], sizes = [16, 8], strides = [1, 1]} : vector<16x64xf32> to vector<16x8xf32>
    %102 = vector.extract_strided_slice %56 {offsets = [0, 32], sizes = [16, 8], strides = [1, 1]} : vector<16x64xf32> to vector<16x8xf32>
    %103 = vector.extract_strided_slice %56 {offsets = [0, 40], sizes = [16, 8], strides = [1, 1]} : vector<16x64xf32> to vector<16x8xf32>
    %104 = vector.extract_strided_slice %56 {offsets = [0, 48], sizes = [16, 8], strides = [1, 1]} : vector<16x64xf32> to vector<16x8xf32>
    %105 = vector.extract_strided_slice %56 {offsets = [0, 56], sizes = [16, 8], strides = [1, 1]} : vector<16x64xf32> to vector<16x8xf32>
    %106 = vector.shape_cast %98 : vector<16x8xf32> to vector<1x16x8xf32>
    %107 = vector.shape_cast %99 : vector<16x8xf32> to vector<1x16x8xf32>
    %108 = vector.shape_cast %100 : vector<16x8xf32> to vector<1x16x8xf32>
    %109 = vector.shape_cast %101 : vector<16x8xf32> to vector<1x16x8xf32>
    %110 = vector.shape_cast %102 : vector<16x8xf32> to vector<1x16x8xf32>
    %111 = vector.shape_cast %103 : vector<16x8xf32> to vector<1x16x8xf32>
    %112 = vector.shape_cast %104 : vector<16x8xf32> to vector<1x16x8xf32>
    %113 = vector.shape_cast %105 : vector<16x8xf32> to vector<1x16x8xf32>
    %114 = tpu.concatenate %106, %107, %108, %109, %110, %111, %112, %113 in 0 : vector<1x16x8xf32>, vector<1x16x8xf32>, vector<1x16x8xf32>, vector<1x16x8xf32>, vector<1x16x8xf32>, vector<1x16x8xf32>, vector<1x16x8xf32>, vector<1x16x8xf32> -> vector<8x16x8xf32>
    %115 = arith.truncf %114 : vector<8x16x8xf32> to vector<8x16x8xbf16>
    %116 = vector.extract_strided_slice %79 {offsets = [0, 0], sizes = [16, 8], strides = [1, 1]} : vector<16x64xf32> to vector<16x8xf32>
    %117 = vector.extract_strided_slice %79 {offsets = [0, 8], sizes = [16, 8], strides = [1, 1]} : vector<16x64xf32> to vector<16x8xf32>
    %118 = vector.extract_strided_slice %79 {offsets = [0, 16], sizes = [16, 8], strides = [1, 1]} : vector<16x64xf32> to vector<16x8xf32>
    %119 = vector.extract_strided_slice %79 {offsets = [0, 24], sizes = [16, 8], strides = [1, 1]} : vector<16x64xf32> to vector<16x8xf32>
    %120 = vector.extract_strided_slice %79 {offsets = [0, 32], sizes = [16, 8], strides = [1, 1]} : vector<16x64xf32> to vector<16x8xf32>
    %121 = vector.extract_strided_slice %79 {offsets = [0, 40], sizes = [16, 8], strides = [1, 1]} : vector<16x64xf32> to vector<16x8xf32>
    %122 = vector.extract_strided_slice %79 {offsets = [0, 48], sizes = [16, 8], strides = [1, 1]} : vector<16x64xf32> to vector<16x8xf32>
    %123 = vector.extract_strided_slice %79 {offsets = [0, 56], sizes = [16, 8], strides = [1, 1]} : vector<16x64xf32> to vector<16x8xf32>
    %124 = vector.shape_cast %116 : vector<16x8xf32> to vector<1x16x8xf32>
    %125 = vector.shape_cast %117 : vector<16x8xf32> to vector<1x16x8xf32>
    %126 = vector.shape_cast %118 : vector<16x8xf32> to vector<1x16x8xf32>
    %127 = vector.shape_cast %119 : vector<16x8xf32> to vector<1x16x8xf32>
    %128 = vector.shape_cast %120 : vector<16x8xf32> to vector<1x16x8xf32>
    %129 = vector.shape_cast %121 : vector<16x8xf32> to vector<1x16x8xf32>
    %130 = vector.shape_cast %122 : vector<16x8xf32> to vector<1x16x8xf32>
    %131 = vector.shape_cast %123 : vector<16x8xf32> to vector<1x16x8xf32>
    %132 = tpu.concatenate %124, %125, %126, %127, %128, %129, %130, %131 in 0 : vector<1x16x8xf32>, vector<1x16x8xf32>, vector<1x16x8xf32>, vector<1x16x8xf32>, vector<1x16x8xf32>, vector<1x16x8xf32>, vector<1x16x8xf32>, vector<1x16x8xf32> -> vector<8x16x8xf32>
    %133 = arith.truncf %132 : vector<8x16x8xf32> to vector<8x16x8xbf16>
    "tpu.trace_start"() <{level = 10 : i32, message = "hqd,hkd->hqk"}> : () -> ()
    %cst_21 = arith.constant dense<0.000000e+00> : vector<8x16x16xf32>
    %134 = tpu.matmul %97, %115, %cst_21 {dimension_numbers = #tpu.dot_dimension_numbers<[2], [2], [1], [1], [0, 0, 0, 1, 1, 1], [0], [0]>} : vector<8x16x8xbf16>, vector<8x16x8xbf16>, vector<8x16x16xf32> -> vector<8x16x16xf32>
    "tpu.trace_stop"() : () -> ()
    %cst_22 = arith.constant 0.353553385 : f32
    %135 = vector.broadcast %cst_22 : f32 to vector<8x16x16xf32>
    %136 = arith.mulf %134, %135 : vector<8x16x16xf32>
    %cst_23 = arith.constant dense<0xFF800000> : vector<8x16xf32>
    %137 = vector.multi_reduction <maximumf>, %136, %cst_23 [2] : vector<8x16x16xf32> to vector<8x16xf32>
    %138 = vector.shape_cast %137 : vector<8x16xf32> to vector<8x16x1xf32>
    %139 = vector.broadcast %138 : vector<8x16x1xf32> to vector<8x16x16xf32>
    %140 = arith.subf %136, %139 : vector<8x16x16xf32>
    %141 = math.exp %140 : vector<8x16x16xf32>
    %cst_24 = arith.constant dense<0.000000e+00> : vector<8x16xf32>
    %142 = vector.multi_reduction <add>, %141, %cst_24 [2] : vector<8x16x16xf32> to vector<8x16xf32>
    %143 = vector.shape_cast %142 : vector<8x16xf32> to vector<8x16x1xf32>
    %144 = tpu.reciprocal %143 : vector<8x16x1xf32> -> vector<8x16x1xf32>
    %145 = vector.broadcast %144 : vector<8x16x1xf32> to vector<8x16x16xf32>
    %146 = arith.mulf %141, %145 : vector<8x16x16xf32>
    %147 = arith.truncf %146 : vector<8x16x16xf32> to vector<8x16x16xbf16>
    "tpu.trace_start"() <{level = 10 : i32, message = "hqk,hkd->hqd"}> : () -> ()
    %cst_25 = arith.constant dense<0.000000e+00> : vector<8x16x8xf32>
    %148 = tpu.matmul %147, %133, %cst_25 {dimension_numbers = #tpu.dot_dimension_numbers<[2], [1], [1], [2], [0, 0, 0, 1, 1, 2], [0], [0]>} : vector<8x16x16xbf16>, vector<8x16x8xbf16>, vector<8x16x8xf32> -> vector<8x16x8xf32>
    "tpu.trace_stop"() : () -> ()
    %149 = arith.truncf %148 : vector<8x16x8xf32> to vector<8x16x8xbf16>
    %c0_26 = arith.constant 0 : index
    %c0_27 = arith.constant 0 : index
    %c0_28 = arith.constant 0 : index
    %150 = vector.load %arg4[%c0_26, %c0_27, %c0_28] : memref<8x8x64xbf16, #tpu.memory_space<vmem>>, vector<8x8x64xbf16>
    "tpu.trace_start"() <{level = 10 : i32, message = "hnd,hdk->hnk"}> : () -> ()
    %cst_29 = arith.constant dense<0.000000e+00> : vector<8x16x64xf32>
    %151 = tpu.matmul %149, %150, %cst_29 {dimension_numbers = #tpu.dot_dimension_numbers<[2], [1], [1], [2], [0, 0, 0, 1, 1, 2], [0], [0]>} : vector<8x16x8xbf16>, vector<8x8x64xbf16>, vector<8x16x64xf32> -> vector<8x16x64xf32>
    "tpu.trace_stop"() : () -> ()
    %cst_30 = arith.constant dense<0.000000e+00> : vector<16x64xf32>
    %152 = vector.multi_reduction <add>, %151, %cst_30 [0] : vector<8x16x64xf32> to vector<16x64xf32>
    %153 = vector.broadcast %10 : vector<1x64xf32> to vector<16x64xf32>
    %154 = arith.addf %152, %153 : vector<16x64xf32>
    %155 = arith.truncf %154 : vector<16x64xf32> to vector<16x64xbf16>
    %c0_31 = arith.constant 0 : index
    %c0_32 = arith.constant 0 : index
    %c0_33 = arith.constant 0 : index
    %156 = vector.load %arg5[%c0_31, %c0_32, %c0_33] : memref<1x16x64xbf16, #tpu.memory_space<vmem>>, vector<1x16x64xbf16>
    %157 = vector.shape_cast %156 : vector<1x16x64xbf16> to vector<16x64xbf16>
    %158 = vector.shape_cast %155 : vector<16x64xbf16> to vector<1x16x64xbf16>
    tpu.vector_store %arg5[%c0_31, %c0_32, %c0_33], %158 {strides = array<i32>} : memref<1x16x64xbf16, #tpu.memory_space<vmem>>, vector<1x16x64xbf16>,
    return
  }
  func.func @transform_0(%arg0: i32) -> (i32, i32, i32) {
    %c0_i32 = arith.constant 0 : i32
    %c0_i32_0 = arith.constant 0 : i32
    %c0_i32_1 = arith.constant 0 : i32
    return %arg0, %c0_i32, %c0_i32_0 : i32, i32, i32
  }
  func.func @transform_1(%arg0: i32) -> (i32, i32) {
    %c0_i32 = arith.constant 0 : i32
    %c0_i32_0 = arith.constant 0 : i32
    %c0_i32_1 = arith.constant 0 : i32
    return %c0_i32, %c0_i32_0 : i32, i32
  }
  func.func @transform_2(%arg0: i32) -> (i32, i32) {
    %c0_i32 = arith.constant 0 : i32
    %c0_i32_0 = arith.constant 0 : i32
    %c0_i32_1 = arith.constant 0 : i32
    return %c0_i32, %c0_i32_0 : i32, i32
  }
  func.func @transform_3(%arg0: i32) -> (i32, i32, i32) {
    %c0_i32 = arith.constant 0 : i32
    %c0_i32_0 = arith.constant 0 : i32
    %c0_i32_1 = arith.constant 0 : i32
    %c0_i32_2 = arith.constant 0 : i32
    return %c0_i32, %c0_i32_0, %c0_i32_1 : i32, i32, i32
  }
  func.func @transform_4(%arg0: i32) -> (i32, i32, i32) {
    %c0_i32 = arith.constant 0 : i32
    %c0_i32_0 = arith.constant 0 : i32
    %c0_i32_1 = arith.constant 0 : i32
    return %arg0, %c0_i32, %c0_i32_0 : i32, i32, i32
  }
}

</mosaic_0001>

<bundles_post_ra>
// kernel: tpu_custom_call.1
= control target key start
LH: loop header
LB: loop body
LE: loop exit
PB: predicated region body
PF: predicated region fallthrough
CT: control target
= control target key end

     0   :  { %9 = vsyncpa [#allocation3], 0  ;;  %s3348_s0 = inlined_call_operand.hbm [shape: bf16[2,16,64], index: 0, kind: input, shape index: {}]   ;;  %s3349_s1 = inlined_call_operand.hbm [shape: bf16[64,192], index: 1, kind: input, shape index: {}]   ;;  %s3350_s2 = inlined_call_operand.hbm [shape: f32[4,192], index: 2, kind: input, shape index: {}]   ;;  %s3351_s3 = inlined_call_operand.hbm [shape: bf16[8,8,64], index: 3, kind: input, shape index: {}]   ;;  %s3352_s4 = inlined_call_operand.hbm [shape: bf16[2,16,64], index: 4, kind: output, shape index: {}]  }
   0x1   :  { %11 = vsyncpa [#allocation3 + $0x1], 0 }
   0x2   :  { %12 = vsyncpa [#allocation6], 0 }
   0x3   :  { %13 = vsyncpa [#allocation9], 0 }
   0x4   :  { %14 = vsyncpa [#allocation4], 0 }
   0x5   :  { %16 = vsyncpa [#allocation4 + $0x1], 0  ;;  %s2604_s15 = smov 0   ;;  %s2606_s16 = smov 0  }
   0x6   :  { %s2608_s17 = smov 0   ;;  %s2610_s18 = smov 0  }
   0x7 LB: > { %s2625_s19 = sadd.s32 4294967295, %s2560_s18   ;;  %s1998_s20 = sadd.s32 4294967294, %s2560_s18   ;;  %s2560_s18 = sphi %s2610_s18, %s3377_s18   ;;  %s2556_s17 = sphi %s2608_s17, %s3376_s17   ;;  %s2552_s16 = sphi %s2606_s16, %s3375_s16   ;;  %s2548_s15 = sphi %s2604_s15, %s3374_s15  }
   0x8   : > { %p42_p0 = scmp.ne.s32.totalorder %s2552_s16, %s2548_s15  ;;  %p43_p1 = scmp.eq.s32.totalorder %s2625_s19, 0 }
   0x9   : > { %p129_p2 = scmp.eq.s32.totalorder %s2625_s19, 1  ;;  %p135_p3 = scmp.eq.s32.totalorder %s1998_s20, 1 }
   0xa   : > { %p2634_p4 = por %p43_p1, %p42_p0  ;;  %p1999_p5 = scmp.ge.s32.totalorder %s2560_s18, 1 }
   0xb   : > { %p2639_p6 = por %p135_p3, %p42_p0  ;;  %p142_p7 = scmp.lt.s32.totalorder %s2560_s18, 3 }
   0xc   : > { %s153_s25 = sshll.u32 %s3349_s1, 4  ;;  %s2562_s27 = smov [#allocation5]   ;;  %s154_s25 = int_to_ptr.hbm [resolvable:$true] %s153_s25 }
   0xd   : > { %p2647_p8 = pnand %p1999_p5, %p142_p7  ;;  %s155_s28 = sshll.u32 %s2562_s27, 4  ;;  %s156_s28 = int_to_ptr.vmem [resolvable:$true] %s155_s28 }
   0xe   : > { %s168_s6 = sshll.u32 %s3350_s2, 4  ;;  %s2563_s7 = smov 128   ;;  %s169_s6 = int_to_ptr.hbm [resolvable:$true] %s168_s6 }
   0xf   : > { %p2107_p9 = pneg %p2647_p8  ;;  %s2564_s8 = smov 8  }
  0x10   : > { %s2565_s9 = smov [#allocation7]   ;;  %s179_s13 = sshll.u32 %s3351_s3, 4  ;;  %s180_s13 = int_to_ptr.hbm [resolvable:$true] %s179_s13 }
  0x11   : > { %p2655_p10 = pnand %p2107_p9, %p43_p1  ;;  %s170_s10 = sshll.u32 %s2565_s9, 4  ;;  %s171_s10 = int_to_ptr.vmem [resolvable:$true] %s170_s10 }
  0x12   : > { %s2566_s14 = smov [#allocation8]   ;;  %s2567_s23 = smov 64  }
  0x13   : > { %2110 = dma.hbm_to_vmem [thread:$0]  (!%p2655_p10), %s154_s25, 1024, %s156_s28, [#allocation6], %s2563_s7, %s2563_s7, %s2564_s8  }
  0x14   : > { %2113 = dma.hbm_to_vmem [thread:$0]  (!%p2655_p10), %s169_s6, 128, %s171_s10, [#allocation6]  }
  0x15   : > { %s181_s20 = sshll.u32 %s2566_s14, 4  ;;  %s2568_s24 = smov 4   ;;  %s182_s20 = int_to_ptr.vmem [resolvable:$true] %s181_s20 }
  0x16   : > { %2116 = dma.hbm_to_vmem [thread:$0]  (!%p2655_p10), %s180_s13, 512, %s182_s20, [#allocation9], %s2567_s23, %s2567_s23, %s2568_s24  }
  0x17   : > { %s2676_s25 = sadd.s32 1, %s2560_s18   ;;  %s29_s28 = sadd.s32 1, %s2556_s17 }
  0x18   : > { %s26_s27 = ssub.s32 %s2560_s18, %s2676_s25  ;;  %p36_p13 = scmp.ne.s32.totalorder %s2556_s17, %s2552_s16 }
  0x19   : > { %p27_p12 = scmp.eq.s32.totalorder %s26_s27, 0  ;;  %p37_p0 = scmp.eq.s32.totalorder %s2560_s18, 0 }
  0x1a   : > { %p2689_p3 = por %p129_p2, %p36_p13  ;;  %p2128_p5 = scmp.lt.s32.totalorder %s2560_s18, 2 }
  0x1b   : > { %s2685_s30 = scalar_select %p27_p12, %s2556_s17, %s29_s28  }
  0x1c   : > { %s195_s29 = sand.u32 1, %s2556_s17   ;;  %s2080_s6 = sshll.u32 %s2560_s18, 3 }
  0x1d   : > { %p38_p7 = por %p37_p0, %p36_p13  ;;  %s2004_s7 = sshll.u32 %s195_s29, 3 }
  0x1e   : > { %s204_s10 = scalar_lea.hbm %s3348_s0, %s2080_s6  ;;  %s199_s12 = scalar_lea.vmem [#allocation2], %s2004_s7 }
  0x1f   : > { %s205_s11 = sshll.u32 %s204_s10, 4  ;;  %s207_s13 = sshll.u32 %s199_s12, 4  ;;  %s206_s11 = int_to_ptr.hbm [resolvable:$true] %s205_s11  ;;  %s208_s13 = int_to_ptr.vmem [resolvable:$true] %s207_s13 }
  0x20   : > { %p2699_p9 = pnand %p2128_p5, %p38_p7  ;;  %s196_s20 = scalar_lea.sflag [#allocation3], %s195_s29 }
  0x21   : > { %s2456_s27 = sshra.s32 %s206_s11, 4  ;;  %s2463_s7 = scalar_lea.hbm %s3348_s0, 16  ;;  %s2457_s27 = int_to_ptr.hbm [resolvable:$true] %s2456_s27 }
  0x22   : > { %s2458_s28 = scalar_lea.hbm %s2457_s27, 8  ;;  %p2460_p10 = pneg %p2699_p9 }
  0x23   : > { %p2459_p2 = scmp.ne.s32.totalorder %s2457_s27, %s2458_s28  ;;  %p2464_p0 = scmp.lt.s32.totalorder %s2457_s27, %s3348_s0 }
  0x24   : > { %p2465_p5 = scmp.lt.s32.totalorder %s2463_s7, %s2458_s28 }
  0x25   : > { %p2461_p12 = pnand %p2460_p10, %p2459_p2 }
  0x26   : > { %p2466_p7 = por %p2465_p5, %p2464_p0 }
  0x27   : > { %p2462_p13 = pneg %p2461_p12 }
  0x29   : > { %p2467_p11 = pnand %p2466_p7, %p2462_p13 }
  0x2b   : > { %2470 = shalt.err (!%p2467_p11)
}
  0x2c   : > { %2120 = dma.hbm_to_vmem [thread:$0]  (!%p2699_p9), %s206_s11, 128, %s208_s13, %s196_s20, %s2567_s23, %s2567_s23, %s2568_s24  }
  0x2d   : > { %219 = sbr.rel (%p2647_p8) target bundleno = 1736 (0x6c8), region = 36  ;;  %s2719_s29 = sand.u32 (!%p2647_p8), 1, %s2552_s16  }
  0x2e   : > { %s2008_s12 = sshll.u32 (!%p2647_p8), %s2719_s29, 3  ;;  %s222_s27 = scalar_lea.sflag (!%p2647_p8), [#allocation3], %s2719_s29 }
  0x2f   : > { %s225_s28 = scalar_lea.vmem (!%p2647_p8), [#allocation2], %s2008_s12 }
  0x32   : > { %2531 = dma.done.wait (%p2634_p4), %s222_s27, 128  }
  0x33   : > { %2533 = vsyncadd (%p2634_p4), %s222_s27, 4294967168 }
  0x34   : > { %2535 = dma.done.wait (%p43_p1), [#allocation6], 1152  }
  0x35   : > { %2537 = vsyncadd (%p43_p1), [#allocation6], 4294966144 }
  0x36   : > { %2539 = dma.done.wait (%p43_p1), [#allocation9], 512  }
  0x37   : > { %2541 = vsyncadd (%p43_p1), [#allocation9], 4294966784  ;;  %v2043_v0 = vld [vmem:[#allocation5 + $0x30] sm:$0xf]  ;;  %v2089_v1 = vld [vmem:[#allocation5 + $0x34] sm:$0xf0] }
  0x38   : > { %v2035_v2 = vld [vmem:[#allocation5 + $0x20] sm:$0xf]  ;;  %v2044_v3 = vor.u32 %v2089_v1, %v2043_v0  ;;  %v2087_v4 = vld [vmem:[#allocation5 + $0x24] sm:$0xf0]  ;;  %v2027_v6 = vld [vmem:[#allocation5 + $0x10] sm:$0xf] }
  0x39   : > { %v2036_v5 = vor.u32 %v2087_v4, %v2035_v2  ;;  %v2085_v7 = vld [vmem:[#allocation5 + $0x14] sm:$0xf0]  ;;  %v2019_v9 = vld [vmem:[#allocation5] sm:$0xf]  ;;  %v2083_v10 = vld [vmem:[#allocation5 + $0x4] sm:$0xf0] }
  0x3a   : > { %338 = vmatpush.bf16.msra.mxu0 %v2044_v3  ;;  %v2028_v8 = vor.u32 %v2085_v7, %v2027_v6  ;;  %v2020_v11 = vor.u32 %v2083_v10, %v2019_v9  ;;  %v2737_v12 = vld [vmem:[%s225_s28] sm:$0xff]  ;;  %vm330_vm0 = vcmask 523264   ;;  %v2741_v13 = vld [vmem:[#allocation7] sm:$0xff]  ;;  %s2569_s21 = smov 64   ;;  %v2570_v26 = vmov 64.0   ;;  %s2571_s26 = smov 120  }
  0x3b   : > { %v279_v14 = vperm.slane %v2741_v13, 0  ;;  %2287 = vrcp.f32 %v2570_v26  ;;  %v2751_v31 = vperm.slane %v2741_v13, 1  ;;  %v2784_v56 = vperm.slane %v2741_v13, 2  ;;  %s2572_s23 = smov 104   ;;  %s2573_s24 = smov 112  }
  0x3c   : > { %s2574_s11 = smov 80   ;;  %s2575_s13 = smov 72   ;;  %vm731_vm14 = vcmask 64512   ;;  %vm992_vm15 = vcmask 130048  }
  0x3d   : > { %v283_v15 = vperm.slane %v279_v14, 0  ;;  %s2576_s14 = smov 88   ;;  %s2577_s20 = smov 96  }
  0x3e   : > { %339 = vmatpush.bf16.msra.mxu0 %v2036_v5  ;;  %s2090_s6 = sshll.u32 %s2625_s19, 3  ;;  %s265_s8 = scalar_lea.vmem [#allocation10], %s2008_s12 }
  0x3f   : > { %s1892_s10 = scalar_lea.hbm %s3352_s4, %s2090_s6  ;;  %s1893_s19 = sshll.u32 %s265_s8, 4  ;;  %s1894_s19 = int_to_ptr.vmem [resolvable:$true] %s1893_s19 }
  0x40   : > { %s1895_s27 = sshll.u32 %s1892_s10, 4  ;;  %s1881_s28 = scalar_lea.sflag [#allocation4], %s2719_s29  ;;  %s1896_s27 = int_to_ptr.hbm [resolvable:$true] %s1895_s27 }
  0x41   : > { %v2288_v27 = vpop.eup %2287  ;;  %s2500_s12 = sshra.s32 %s1896_s27, 4  ;;  %s2501_s12 = int_to_ptr.hbm [resolvable:$true] %s2500_s12 }
  0x42   : > { %340 = vmatpush.bf16.msra.mxu0 %v2028_v8  ;;  %v369_v28 = vmul.f32 64.0, %v2288_v27  ;;  %vm373_vm1 = vweird.f32 %v2288_v27  ;;  %p2507_p11 = scmp.lt.s32.totalorder %s2501_s12, %s3352_s4 }
  0x44   : > { %v370_v29 = vsub.f32 1.0, %v369_v28 }
  0x46   : > { %341 = vmatpush.bf16.msra.mxu0 %v2020_v11  ;;  %v371_v30 = vmul.f32 %v2288_v27, %v370_v29  ;;  %v2088_v29 = vld [vmem:[#allocation5 + $0x34] sm:$0xf] }
  0x48   : > { %v372_v32 = vadd.f32 %v2288_v27, %v371_v30  ;;  %v2045_v30 = vld [vmem:[#allocation5 + $0x38] sm:$0xf0] }
  0x49   : > { %2049 = vmatmul.msk.bf16.vlgmr.msra.gmra.mxu0 %vm330_vm0, %v2737_v12 }
  0x4a   : > { %v2755_v33 = vsel %vm373_vm1, %v2288_v27, %v372_v32 }
  0xc6   : > { %v343_v16 = vpop.f32.mrf.mxu0 }
  0xc7   : > { %v344_v17 = vadd.f32 %v343_v16, %v283_v15 }
  0xc9   : > { %421 = vrot.lane.b32.xlu0 %v344_v17, %s2569_s21  ;;  %v362_v20 = vsel %vm330_vm0, %v344_v17, 0.0 }
  0xce   : > { %v345_v18 = vpop.f32.mrf.mxu0 }
  0xcf   : > { %v346_v19 = vadd.f32 %v345_v18, %v283_v15 }
  0xd1   : > { %423 = vrot.lane.b32.xlu0 %v346_v19, %s2569_s21  ;;  %v365_v25 = vsel %vm330_vm0, %v346_v19, 0.0 }
  0xfb   : > { %363 = vadd.xlane.f32.xlu0 %v362_v20 }
 0x13b   : > { %v422_v21 = vpop.permute.xlu0 %421 }
 0x13c   : > { %v427_v22 = vsel %vm330_vm0, %v422_v21, 0.0 }
 0x13d   : > { %428 = vadd.xlane.f32.xlu1 %v427_v22 }
 0x143   : > { %v424_v23 = vpop.permute.xlu0 %423 }
 0x144   : > { %v430_v24 = vsel %vm330_vm0, %v424_v23, 0.0 }
 0x145   : > { %431 = vadd.xlane.f32.xlu1 %v430_v24 }
 0x14d   : > { %366 = vadd.xlane.f32.xlu1 %v365_v25 }
 0x166   : > { %480 = vrot.lane.b32.xlu1 %v2751_v31, %s2569_s21 }
 0x16e   : > { %v364_v47 = vpop.xlane.xlu0 %363 }
 0x16f   : > { %v375_v48 = vmul.f32 %v2755_v33, %v364_v47  ;;  %v2086_v47 = vld [vmem:[#allocation5 + $0x24] sm:$0xf] }
 0x171   : > { %v2776_v50 = vsub.f32 %v344_v17, %v375_v48  ;;  %v2037_v48 = vld [vmem:[#allocation5 + $0x28] sm:$0xf0] }
 0x173   : > { %v379_v52 = vmul.f32 %v2776_v50, %v2776_v50 }
 0x175   : > { %v381_v55 = vsel %vm330_vm0, %v379_v52, 0.0  ;;  %v2040_v52 = vor.u32 %v2086_v47, %v2037_v48 }
 0x1b0   : > { %v429_v34 = vpop.xlane.xlu1 %428 }
 0x1b1   : > { %v433_v35 = vmul.f32 %v429_v34, %v2755_v33 }
 0x1b3   : > { %v2758_v36 = vsub.f32 %v344_v17, %v433_v35  ;;  %v2048_v35 = vor.u32 %v2088_v29, %v2045_v30 }
 0x1b5   : > { %v437_v37 = vmul.f32 %v2758_v36, %v2758_v36  ;;  %352 = vmatpush.bf16.msra.mxu1 %v2048_v35 }
 0x1b7   : > { %441 = vrot.lane.b32.xlu2 %v437_v37, %s2569_s21 }
 0x1b8   : > { %v432_v38 = vpop.xlane.xlu1 %431 }
 0x1b9   : > { %v434_v39 = vmul.f32 %v432_v38, %v2755_v33  ;;  %353 = vmatpush.bf16.msra.mxu1 %v2040_v52 }
 0x1bb   : > { %v2764_v40 = vsub.f32 %v346_v19, %v434_v39 }
 0x1bd   : > { %v438_v41 = vmul.f32 %v2764_v40, %v2764_v40 }
 0x1bf   : > { %443 = vrot.lane.b32.xlu2 %v438_v41, %s2569_s21 }
 0x1c0   : > { %v367_v42 = vpop.xlane.xlu1 %366 }
 0x1c1   : > { %v376_v43 = vmul.f32 %v2755_v33, %v367_v42 }
 0x1c3   : > { %v2770_v44 = vsub.f32 %v346_v19, %v376_v43 }
 0x1c5   : > { %v380_v45 = vmul.f32 %v2770_v44, %v2770_v44 }
 0x1c7   : > { %v384_v46 = vsel %vm330_vm0, %v380_v45, 0.0 }
 0x1c8   : > { %385 = vadd.xlane.f32.xlu0 %v384_v46 }
 0x1d8   : > { %v481_v57 = vpop.permute.xlu1 %480 }
 0x211   : > { %v442_v49 = vpop.permute.xlu2 %441 }
 0x212   : > { %v447_v51 = vsel %vm330_vm0, %v442_v49, 0.0  ;;  %v2084_v49 = vld [vmem:[#allocation5 + $0x14] sm:$0xf] }
 0x213   : > { %448 = vadd.xlane.f32.xlu2 %v447_v51 }
 0x219   : > { %v444_v53 = vpop.permute.xlu2 %443 }
 0x21a   : > { %v450_v54 = vsel %vm330_vm0, %v444_v53, 0.0  ;;  %v2029_v53 = vld [vmem:[#allocation5 + $0x18] sm:$0xf0] }
 0x21b   : > { %451 = vadd.xlane.f32.xlu1 %v450_v54  ;;  %382 = vadd.xlane.f32.xlu2 %v381_v55 }
 0x234   : > { %486 = vrot.lane.b32.xlu1 %v2784_v56, %s2569_s21 }
 0x23b   : > { %v386_v61 = vpop.xlane.xlu0 %385 }
 0x23c   : > { %v388_v3 = vmul.f32 %v386_v61, %v2755_v33 }
 0x23e   : > { %v2794_v8 = vadd.f32 1e-05, %v388_v3 }
 0x240   : > { %vm407_vm12 = vweird.f32 %v2794_v8 }
 0x286   : > { %v449_v58 = vpop.xlane.xlu2 %448 }
 0x287   : > { %v453_v59 = vmul.f32 %v449_v58, %v2755_v33 }
 0x289   : > { %v455_v60 = vadd.f32 1e-05, %v453_v59  ;;  %v2082_v59 = vld [vmem:[#allocation5 + $0x4] sm:$0xf] }
 0x28b   : > { %2289 = vrsqrt.f32 %v455_v60  ;;  %vm463_vm3 = vweird.f32 %v455_v60 }
 0x28e   : > { %v452_v62 = vpop.xlane.xlu1 %451  ;;  %v383_v63 = vpop.xlane.xlu2 %382 }
 0x28f   : > { %v454_v0 = vmul.f32 %v452_v62, %v2755_v33  ;;  %v387_v1 = vmul.f32 %v383_v63, %v2755_v33 }
 0x291   : > { %v2290_v2 = vpop.eup %2289  ;;  %v456_v4 = vadd.f32 1e-05, %v454_v0  ;;  %v2792_v6 = vadd.f32 1e-05, %v387_v1 }
 0x292   : > { %v458_v5 = vmul.f32 %v2290_v2, %v455_v60  ;;  %vm464_vm2 = vweird.f32 %v2290_v2  ;;  %v2021_v60 = vld [vmem:[#allocation5 + $0x8] sm:$0xf0] }
 0x293   : > { %2291 = vrsqrt.f32 %v456_v4  ;;  %vm465_vm4 = vmor %vm463_vm3, %vm464_vm2  ;;  %vm473_vm6 = vweird.f32 %v456_v4  ;;  %vm397_vm10 = vweird.f32 %v2792_v6  ;;  %v2024_v0 = vor.u32 %v2082_v59, %v2021_v60 }
 0x294   : > { %v459_v7 = vmul.f32 %v2290_v2, %v458_v5  ;;  %2293 = vrsqrt.f32 %v2792_v6 }
 0x295   : > { %2295 = vrsqrt.f32 %v2794_v8 }
 0x296   : > { %v460_v9 = vmul.f32 0.5, %v459_v7 }
 0x298   : > { %v461_v10 = vsub.f32 1.5, %v460_v9 }
 0x299   : > { %v2292_v11 = vpop.eup %2291 }
 0x29a   : > { %v468_v14 = vmul.f32 %v2292_v11, %v456_v4  ;;  %v462_v15 = vmul.f32 %v2290_v2, %v461_v10  ;;  %v2798_v17 = vpop.eup %2293  ;;  %vm474_vm5 = vweird.f32 %v2292_v11 }
 0x29b   : > { %v2800_v19 = vpop.eup %2295  ;;  %v392_v21 = vmul.f32 %v2798_v17, %v2792_v6  ;;  %vm475_vm7 = vmor %vm473_vm6, %vm474_vm5  ;;  %vm398_vm8 = vweird.f32 %v2798_v17 }
 0x29c   : > { %v469_v16 = vmul.f32 %v2292_v11, %v468_v14  ;;  %v466_v22 = vsel %vm465_vm4, %v2290_v2, %v462_v15  ;;  %v402_v23 = vmul.f32 %v2800_v19, %v2794_v8  ;;  %vm408_vm9 = vweird.f32 %v2800_v19  ;;  %vm399_vm11 = vmor %vm397_vm10, %vm398_vm8 }
 0x29d   : > { %v477_v25 = vmul.f32 %v466_v22, %v2758_v36  ;;  %v393_v26 = vmul.f32 %v2798_v17, %v392_v21  ;;  %vm409_vm13 = vmor %vm407_vm12, %vm408_vm9 }
 0x29e   : > { %v470_v18 = vmul.f32 0.5, %v469_v16  ;;  %v403_v32 = vmul.f32 %v2800_v19, %v402_v23 }
 0x29f   : > { %v483_v37 = vmul.f32 %v481_v57, %v477_v25  ;;  %v394_v39 = vmul.f32 0.5, %v393_v26 }
 0x2a0   : > { %v471_v20 = vsub.f32 1.5, %v470_v18  ;;  %v404_v43 = vmul.f32 0.5, %v403_v32 }
 0x2a1   : > { %v395_v36 = vsub.f32 1.5, %v394_v39 }
 0x2a2   : > { %v472_v24 = vmul.f32 %v2292_v11, %v471_v20  ;;  %v405_v51 = vsub.f32 1.5, %v404_v43 }
 0x2a3   : > { %v396_v55 = vmul.f32 %v2798_v17, %v395_v36 }
 0x2a4   : > { %v476_v27 = vsel %vm475_vm7, %v2292_v11, %v472_v24  ;;  %v406_v61 = vmul.f32 %v2800_v19, %v405_v51 }
 0x2a5   : > { %v478_v28 = vmul.f32 %v476_v27, %v2764_v40  ;;  %v400_v63 = vsel %vm399_vm11, %v2798_v17, %v396_v55 }
 0x2a6   : > { %v487_v34 = vpop.permute.xlu1 %486  ;;  %v410_v1 = vsel %vm409_vm13, %v2800_v19, %v406_v61  ;;  %v411_v2 = vmul.f32 %v400_v63, %v2776_v50 }
 0x2a7   : > { %v484_v38 = vmul.f32 %v481_v57, %v478_v28  ;;  %v489_v41 = vadd.f32 %v487_v34, %v483_v37  ;;  %v2032_v57 = vor.u32 %v2084_v49, %v2029_v53  ;;  %v412_v3 = vmul.f32 %v410_v1, %v2770_v44 }
 0x2a8   : > { %v414_v4 = vmul.f32 %v2751_v31, %v411_v2 }
 0x2a9   : > { %v490_v42 = vadd.f32 %v487_v34, %v484_v38  ;;  %v643_v40 = vpack.c.bf16 %v489_v41, %v489_v41  ;;  %354 = vmatpush.bf16.msra.mxu1 %v2032_v57  ;;  %v415_v5 = vmul.f32 %v2751_v31, %v412_v3 }
 0x2aa   : > { %v417_v6 = vadd.f32 %v2784_v56, %v414_v4 }
 0x2ab   : > { %v2182_v45 = vpack.i.bf16 %v490_v42, %v489_v41  ;;  %v644_v46 = vpack.c.bf16 %v490_v42, %v490_v42  ;;  %v726_v58 = vunpack.c.l.b16 %v643_v40  ;;  %v418_v50 = vadd.f32 %v2784_v56, %v415_v5 }
 0x2ac   : > { %v583_v32 = vpack.c.bf16 %v417_v6, %v417_v6 }
 0x2ad   : > { %2183 = vrot.lane.b32.xlu1 %v2182_v45, %s2571_s26  ;;  %2193 = vrot.lane.b32.xlu0 %v2182_v45, %s2572_s23  ;;  %v727_v54 = vunpack.c.l.b16 %v644_v46  ;;  %v2833_v7 = vpack.i.bf16 %v418_v50, %v417_v6  ;;  %v584_v38 = vpack.c.bf16 %v418_v50, %v418_v50 }
 0x2ae   : > { %2188 = vrot.lane.b32.xlu2 %v2182_v45, %s2573_s24  ;;  %355 = vmatpush.bf16.msra.mxu1 %v2024_v0 }
 0x2af   : > { %v728_v62 = vpack.c.b16 %v727_v54, %v726_v58  ;;  %v722_v40 = vunpack.c.l.b16 %v584_v38 }
 0x2b1   : > { %2050 = vmatmul.msk.bf16.vlgmr.msra.gmra.mxu1 %vm330_vm0, %v2737_v12 }
 0x2b5   : > { %2198 = vrot.lane.b32.xlu1 %v2182_v45, %s2574_s11  ;;  %729 = vrot.lane.b32.xlu0 %v728_v62, %s2569_s21 }
 0x2bd   : > { %2203 = vrot.lane.b32.xlu1 %v2182_v45, %s2575_s13  ;;  %2213 = vrot.lane.b32.xlu0 %v2182_v45, %s2576_s14 }
 0x2c5   : > { %2208 = vrot.lane.b32.xlu1 %v2182_v45, %s2577_s20  ;;  %2223 = vrot.lane.b32.xlu0 %v2833_v7, %s2573_s24  ;;  %v721_v45 = vunpack.c.l.b16 %v583_v32 }
 0x2c7   : > { %v723_v52 = vpack.c.b16 %v722_v40, %v721_v45 }
 0x2cd   : > { %2218 = vrot.lane.b32.xlu1 %v2833_v7, %s2571_s26 }
 0x308   : > { %v2189_v12 = vpop.permute.xlu2 %2188 }
 0x309   : > { %v2191_v15 = vunpack.i.h.bf16 %v2189_v12  ;;  %v2190_v16 = vunpack.i.l.bf16 %v2189_v12 }
 0x30b   : > { %v648_v25 = vpack.c.bf16 %v2191_v15, %v2191_v15  ;;  %v647_v26 = vpack.c.bf16 %v2190_v16, %v2190_v16 }
 0x30d   : > { %v792_v39 = vunpack.c.l.b16 %v648_v25  ;;  %v791_v41 = vunpack.c.l.b16 %v647_v26 }
 0x30f   : > { %v793_v47 = vpack.c.b16 %v792_v39, %v791_v41 }
 0x31f   : > { %v2184_v44 = vpop.permute.xlu1 %2183  ;;  %v2194_v8 = vpop.permute.xlu0 %2193 }
 0x320   : > { %v2186_v9 = vunpack.i.h.bf16 %v2184_v44  ;;  %v2185_v10 = vunpack.i.l.bf16 %v2184_v44  ;;  %v2196_v11 = vunpack.i.h.bf16 %v2194_v8  ;;  %v2195_v14 = vunpack.i.l.bf16 %v2194_v8 }
 0x322   : > { %v646_v17 = vpack.c.bf16 %v2186_v9, %v2186_v9  ;;  %v645_v18 = vpack.c.bf16 %v2185_v10, %v2185_v10  ;;  %v650_v19 = vpack.c.bf16 %v2196_v11, %v2196_v11  ;;  %v649_v20 = vpack.c.bf16 %v2195_v14, %v2195_v14 }
 0x323   : > { %v280_v11 = vperm.slane %v2741_v13, 4 }
 0x324   : > { %v760_v21 = vunpack.c.l.b16 %v646_v17  ;;  %v759_v22 = vunpack.c.l.b16 %v645_v18  ;;  %v824_v23 = vunpack.c.l.b16 %v650_v19  ;;  %v823_v24 = vunpack.c.l.b16 %v649_v20 }
 0x325   : > { %v284_v14 = vperm.slane %v280_v11, 0 }
 0x326   : > { %v761_v27 = vpack.c.b16 %v760_v21, %v759_v22  ;;  %v825_v28 = vpack.c.b16 %v824_v23, %v823_v24 }
 0x327   : > { %v2199_v29 = vpop.permute.xlu1 %2198  ;;  %v730_v30 = vpop.permute.xlu0 %729 }
 0x328   : > { %v2201_v34 = vunpack.i.h.bf16 %v2199_v29  ;;  %v2200_v35 = vunpack.i.l.bf16 %v2199_v29  ;;  %762 = vrot.lane.b32.xlu2 %v761_v27, %s2569_s21  ;;  %826 = vrot.lane.b32.xlu1 %v825_v28, %s2569_s21  ;;  %v736_v37 = vsel %vm731_vm14, %v730_v30, 0 }
 0x329   : > { %745 = vmatpush.bf16.xpose.msra.mxu2 %v736_v37 }
 0x32a   : > { %v656_v42 = vpack.c.bf16 %v2201_v34, %v2201_v34  ;;  %v655_v43 = vpack.c.bf16 %v2200_v35, %v2200_v35 }
 0x32c   : > { %v920_v36 = vunpack.c.l.b16 %v656_v42  ;;  %v919_v46 = vunpack.c.l.b16 %v655_v43 }
 0x32e   : > { %v921_v48 = vpack.c.b16 %v920_v36, %v919_v46  ;;  %v357_v10 = vpop.f32.mrf.mxu1 }
 0x32f   : > { %v2204_v49 = vpop.permute.xlu1 %2203  ;;  %v2214_v51 = vpop.permute.xlu0 %2213  ;;  %v2864_v18 = vadd.f32 %v357_v10, %v284_v14 }
 0x330   : > { %794 = vrot.lane.b32.xlu2 %v793_v47, %s2569_s21  ;;  %922 = vrot.lane.b32.xlu0 %v921_v48, %s2569_s21  ;;  %v2206_v53 = vunpack.i.h.bf16 %v2204_v49  ;;  %v2205_v54 = vunpack.i.l.bf16 %v2204_v49  ;;  %v2216_v55 = vunpack.i.h.bf16 %v2214_v51  ;;  %v2215_v57 = vunpack.i.l.bf16 %v2214_v51 }
 0x331   : > { %2051 = vmatmul.msk.bf16.vlgmr.msra.gmra.mxu2 %vm731_vm14, %v723_v52  ;;  %2233 = vrot.lane.b32.xlu1 %v2833_v7, %s2574_s11  ;;  %v491_v19 = vsel %vm330_vm0, %v2864_v18, 0.0 }
 0x332   : > { %v658_v58 = vpack.c.bf16 %v2206_v53, %v2206_v53  ;;  %v657_v59 = vpack.c.bf16 %v2205_v54, %v2205_v54  ;;  %v654_v60 = vpack.c.bf16 %v2216_v55, %v2216_v55  ;;  %v653_v61 = vpack.c.bf16 %v2215_v57, %v2215_v57 }
 0x334   : > { %v952_v1 = vunpack.c.l.b16 %v658_v58  ;;  %v951_v2 = vunpack.c.l.b16 %v657_v59  ;;  %v888_v3 = vunpack.c.l.b16 %v654_v60  ;;  %v887_v4 = vunpack.c.l.b16 %v653_v61 }
 0x336   : > { %v953_v44 = vpack.c.b16 %v952_v1, %v951_v2  ;;  %v889_v8 = vpack.c.b16 %v888_v3, %v887_v4  ;;  %v359_v15 = vpop.f32.mrf.mxu1 }
 0x337   : > { %v2209_v62 = vpop.permute.xlu1 %2208  ;;  %v2860_v16 = vadd.f32 %v359_v15, %v284_v14  ;;  %v2224_v13 = vpop.permute.xlu0 %2223 }
 0x338   : > { %v2211_v63 = vunpack.i.h.bf16 %v2209_v62  ;;  %v2210_v0 = vunpack.i.l.bf16 %v2209_v62  ;;  %2228 = vrot.lane.b32.xlu2 %v2833_v7, %s2572_s23  ;;  %2238 = vrot.lane.b32.xlu0 %v2833_v7, %s2575_s13  ;;  %v2226_v26 = vunpack.i.h.bf16 %v2224_v13  ;;  %v2225_v27 = vunpack.i.l.bf16 %v2224_v13 }
 0x339   : > { %v494_v17 = vsel %vm330_vm0, %v2860_v16, 0.0 }
 0x33a   : > { %v652_v5 = vpack.c.bf16 %v2211_v63, %v2211_v63  ;;  %v651_v6 = vpack.c.bf16 %v2210_v0, %v2210_v0  ;;  %v588_v30 = vpack.c.bf16 %v2226_v26, %v2226_v26  ;;  %v587_v32 = vpack.c.bf16 %v2225_v27, %v2225_v27 }
 0x33c   : > { %v856_v50 = vunpack.c.l.b16 %v652_v5  ;;  %v855_v12 = vunpack.c.l.b16 %v651_v6  ;;  %v787_v38 = vunpack.c.l.b16 %v588_v30  ;;  %v786_v39 = vunpack.c.l.b16 %v587_v32 }
 0x33e   : > { %v857_v9 = vpack.c.b16 %v856_v50, %v855_v12  ;;  %v788_v41 = vpack.c.b16 %v787_v38, %v786_v39 }
 0x33f   : > { %v2219_v20 = vpop.permute.xlu1 %2218 }
 0x340   : > { %954 = vrot.lane.b32.xlu2 %v953_v44, %s2569_s21  ;;  %890 = vrot.lane.b32.xlu0 %v889_v8, %s2569_s21  ;;  %v2221_v21 = vunpack.i.h.bf16 %v2219_v20 }
 0x341   : > { %858 = vrot.lane.b32.xlu1 %v857_v9, %s2569_s21 }
 0x342   : > { %v586_v22 = vpack.c.bf16 %v2221_v21, %v2221_v21 }
 0x344   : > { %v755_v28 = vunpack.c.l.b16 %v586_v22 }
 0x348   : > { %2243 = vrot.lane.b32.xlu2 %v2833_v7, %s2577_s20 }
 0x349   : > { %2248 = vrot.lane.b32.xlu1 %v2833_v7, %s2576_s14  ;;  %v2220_v7 = vunpack.i.l.bf16 %v2219_v20 }
 0x34b   : > { %v585_v23 = vpack.c.bf16 %v2220_v7, %v2220_v7 }
 0x34d   : > { %v754_v29 = vunpack.c.l.b16 %v585_v23 }
 0x34f   : > { %v756_v34 = vpack.c.b16 %v755_v28, %v754_v29 }
 0x36a   : > { %495 = vadd.xlane.f32.xlu0 %v494_v17 }
 0x371   : > { %492 = vadd.xlane.f32.xlu2 %v491_v19 }
 0x382   : > { %v763_v24 = vpop.permute.xlu2 %762 }
 0x383   : > { %v768_v25 = vsel %vm731_vm14, %v763_v24, 0 }
 0x384   : > { %777 = vmatpush.bf16.xpose.msra.mxu3 %v768_v25 }
 0x38a   : > { %v795_v35 = vpop.permute.xlu2 %794 }
 0x38b   : > { %2052 = vmatmul.msk.bf16.vlgmr.msra.gmra.mxu3 %vm731_vm14, %v756_v34  ;;  %v800_v37 = vsel %vm731_vm14, %v795_v35, 0 }
 0x38c   : > { %809 = vmatpush.bf16.xpose.msrb.mxu2 %v800_v37 }
 0x392   : > { %v2229_v42 = vpop.permute.xlu2 %2228 }
 0x393   : > { %2053 = vmatmul.msk.bf16.vlgmr.msrb.gmra.mxu2 %vm731_vm14, %v788_v41  ;;  %v2231_v43 = vunpack.i.h.bf16 %v2229_v42  ;;  %v2230_v45 = vunpack.i.l.bf16 %v2229_v42 }
 0x395   : > { %v590_v36 = vpack.c.bf16 %v2231_v43, %v2231_v43  ;;  %v589_v46 = vpack.c.bf16 %v2230_v45, %v2230_v45 }
 0x397   : > { %v819_v51 = vunpack.c.l.b16 %v590_v36  ;;  %v818_v52 = vunpack.c.l.b16 %v589_v46 }
 0x399   : > { %v820_v53 = vpack.c.b16 %v819_v51, %v818_v52 }
 0x39a   : > { %v955_v40 = vpop.permute.xlu2 %954  ;;  %v827_v47 = vpop.permute.xlu1 %826 }
 0x39b   : > { %v960_v48 = vsel %vm731_vm14, %v955_v40, 0  ;;  %v832_v49 = vsel %vm731_vm14, %v827_v47, 0 }
 0x39c   : > { %841 = vmatpush.bf16.xpose.msrb.mxu3 %v832_v49 }
 0x3a2   : > { %v923_v54 = vpop.permute.xlu0 %922  ;;  %v2244_v2 = vpop.permute.xlu2 %2243 }
 0x3a3   : > { %v928_v55 = vsel %vm731_vm14, %v923_v54, 0  ;;  %v2234_v57 = vpop.permute.xlu1 %2233  ;;  %2054 = vmatmul.msk.bf16.vlgmr.msrb.gmra.mxu3 %vm731_vm14, %v820_v53  ;;  %v2246_v50 = vunpack.i.h.bf16 %v2244_v2  ;;  %v2245_v12 = vunpack.i.l.bf16 %v2244_v2 }
 0x3a4   : > { %969 = vmatpush.bf16.xpose.msra.mxu3 %v960_v48  ;;  %v2236_v58 = vunpack.i.h.bf16 %v2234_v57  ;;  %v2235_v59 = vunpack.i.l.bf16 %v2234_v57  ;;  %937 = vmatpush.bf16.xpose.msra.mxu2 %v928_v55 }
 0x3a5   : > { %v592_v10 = vpack.c.bf16 %v2246_v50, %v2246_v50  ;;  %v591_v11 = vpack.c.bf16 %v2245_v12, %v2245_v12 }
 0x3a6   : > { %v596_v60 = vpack.c.bf16 %v2236_v58, %v2236_v58  ;;  %v595_v61 = vpack.c.bf16 %v2235_v59, %v2235_v59 }
 0x3a7   : > { %v851_v21 = vunpack.c.l.b16 %v592_v10  ;;  %v850_v7 = vunpack.c.l.b16 %v591_v11 }
 0x3a8   : > { %v915_v62 = vunpack.c.l.b16 %v596_v60  ;;  %v914_v63 = vunpack.c.l.b16 %v595_v61 }
 0x3a9   : > { %v852_v22 = vpack.c.b16 %v851_v21, %v850_v7 }
 0x3aa   : > { %v916_v0 = vpack.c.b16 %v915_v62, %v914_v63  ;;  %v2239_v1 = vpop.permute.xlu0 %2238 }
 0x3ab   : > { %v2241_v3 = vunpack.i.h.bf16 %v2239_v1  ;;  %v2240_v4 = vunpack.i.l.bf16 %v2239_v1 }
 0x3ac   : > { %2057 = vmatmul.msk.bf16.vlgmr.msra.gmra.mxu2 %vm731_vm14, %v916_v0 }
 0x3ad   : > { %v598_v5 = vpack.c.bf16 %v2241_v3, %v2241_v3  ;;  %v597_v6 = vpack.c.bf16 %v2240_v4, %v2240_v4 }
 0x3af   : > { %v947_v44 = vunpack.c.l.b16 %v598_v5  ;;  %v946_v8 = vunpack.c.l.b16 %v597_v6 }
 0x3b1   : > { %v948_v9 = vpack.c.b16 %v947_v44, %v946_v8 }
 0x3b2   : > { %v891_v14 = vpop.permute.xlu0 %890 }
 0x3b3   : > { %v859_v15 = vpop.permute.xlu1 %858  ;;  %2058 = vmatmul.msk.bf16.vlgmr.msra.gmra.mxu3 %vm731_vm14, %v948_v9  ;;  %v896_v17 = vsel %vm731_vm14, %v891_v14, 0 }
 0x3b4   : > { %v747_v19 = vpop.f32.mrf.mxu2  ;;  %v864_v20 = vsel %vm731_vm14, %v859_v15, 0  ;;  %905 = vmatpush.bf16.xpose.msrb.mxu1 %v896_v17 }
 0x3b5   : > { %873 = vmatpush.bf16.xpose.msrb.mxu0 %v864_v20  ;;  %v2894_v36 = vmul.f32 0.35355338, %v747_v19 }
 0x3b7   : > { %v993_v40 = vsel %vm992_vm15, %v2894_v36, -inf }
 0x3bb   : > { %v2249_v23 = vpop.permute.xlu1 %2248 }
 0x3bc   : > { %v2251_v13 = vunpack.i.h.bf16 %v2249_v23  ;;  %v2250_v24 = vunpack.i.l.bf16 %v2249_v23  ;;  %v749_v25 = vpop.f32.mrf.mxu2  ;;  %2055 = vmatmul.msk.bf16.vlgmr.msrb.gmra.mxu0 %vm731_vm14, %v852_v22 }
 0x3bd   : > { %v977_v26 = vmul.f32 0.35355338, %v749_v25 }
 0x3be   : > { %v594_v27 = vpack.c.bf16 %v2251_v13, %v2251_v13  ;;  %v593_v28 = vpack.c.bf16 %v2250_v24, %v2250_v24 }
 0x3bf   : > { %v996_v29 = vsel %vm992_vm15, %v977_v26, -inf }
 0x3c0   : > { %v883_v30 = vunpack.c.l.b16 %v594_v27  ;;  %v882_v32 = vunpack.c.l.b16 %v593_v28  ;;  %997 = vmax.xlane.f32.xlu1 %v996_v29 }
 0x3c2   : > { %v884_v34 = vpack.c.b16 %v883_v30, %v882_v32 }
 0x3c4   : > { %2056 = vmatmul.msk.bf16.vlgmr.msrb.gmra.mxu1 %vm731_vm14, %v884_v34 }
 0x3dd   : > { %v496_v35 = vpop.xlane.xlu0 %495 }
 0x3de   : > { %v498_v37 = vmul.f32 %v496_v35, %v2755_v33 }
 0x3e0   : > { %v2885_v38 = vsub.f32 %v2860_v16, %v498_v37 }
 0x3e2   : > { %v502_v39 = vmul.f32 %v2885_v38, %v2885_v38 }
 0x3e4   : > { %v493_v41 = vpop.xlane.xlu2 %492  ;;  %v506_v42 = vsel %vm330_vm0, %v502_v39, 0.0 }
 0x3e5   : > { %v497_v43 = vmul.f32 %v493_v41, %v2755_v33  ;;  %507 = vadd.xlane.f32.xlu2 %v506_v42 }
 0x3e7   : > { %v2892_v45 = vsub.f32 %v2864_v18, %v497_v43 }
 0x3e9   : > { %v501_v46 = vmul.f32 %v2892_v45, %v2892_v45 }
 0x3eb   : > { %v503_v16 = vsel %vm330_vm0, %v501_v46, 0.0 }
 0x3ec   : > { %504 = vadd.xlane.f32.xlu0 %v503_v16 }
 0x3ed   : > { %994 = vmax.xlane.f32.xlu2 %v993_v40 }
 0x40e   : > { %v779_v47 = vpop.f32.mrf.mxu3 }
 0x40f   : > { %v2905_v53 = vmul.f32 0.35355338, %v779_v47 }
 0x411   : > { %v999_v62 = vsel %vm992_vm15, %v2905_v53, -inf }
 0x416   : > { %v781_v48 = vpop.f32.mrf.mxu3  ;;  %v811_v52 = vpop.f32.mrf.mxu2 }
 0x417   : > { %v2921_v4 = vmul.f32 0.35355338, %v811_v52  ;;  %v2931_v9 = vmul.f32 0.35355338, %v781_v48 }
 0x419   : > { %v1005_v8 = vsel %vm992_vm15, %v2921_v4, -inf  ;;  %v1002_v14 = vsel %vm992_vm15, %v2931_v9, -inf }
 0x41e   : > { %v813_v1 = vpop.f32.mrf.mxu2 }
 0x41f   : > { %v2919_v3 = vmul.f32 0.35355338, %v813_v1 }
 0x421   : > { %v1008_v12 = vsel %vm992_vm15, %v2919_v3, -inf }
 0x426   : > { %v2907_v54 = vpop.f32.mrf.mxu3 }
 0x427   : > { %v2960_v52 = vmul.f32 0.35355338, %v2907_v54 }
 0x42e   : > { %v845_v50 = vpop.f32.mrf.mxu3 }
 0x42f   : > { %v939_v11 = vpop.f32.mrf.mxu2  ;;  %v2939_v19 = vmul.f32 0.35355338, %v845_v50 }
 0x431   : > { %v1014_v13 = vsel %vm992_vm15, %v2939_v19, -inf }
 0x433   : > { %v998_v55 = vpop.xlane.xlu1 %997 }
 0x434   : > { %v1042_v61 = vsub.f32 %v977_v26, %v998_v55 }
 0x436   : > { %v1059_v2 = vmul.f32 1.442695, %v1042_v61  ;;  %v971_v17 = vpop.f32.mrf.mxu3 }
 0x437   : > { %v2941_v20 = vmul.f32 0.35355338, %v971_v17  ;;  %v941_v24 = vpop.f32.mrf.mxu2 }
 0x438   : > { %2297 = vpow2.f32 %v1059_v2  ;;  %v2948_v26 = vmul.f32 0.35355338, %v941_v24 }
 0x439   : > { %v875_v49 = vpop.f32.mrf.mxu0  ;;  %v1035_v23 = vsel %vm992_vm15, %v2941_v20, -inf }
 0x43a   : > { %v2901_v51 = vmul.f32 0.35355338, %v875_v49  ;;  %v1032_v37 = vsel %vm992_vm15, %v2948_v26, -inf }
 0x43c   : > { %v1017_v18 = vsel %vm992_vm15, %v2901_v51, -inf }
 0x43d   : > { %1018 = vmax.xlane.f32.xlu0 %v1017_v18 }
 0x43e   : > { %v2933_v10 = vpop.eup %2297 }
 0x43f   : > { %v1092_v15 = vsel %vm992_vm15, %v2933_v10, 0.0 }
 0x441   : > { %v877_v57 = vpop.f32.mrf.mxu0  ;;  %v907_v58 = vpop.f32.mrf.mxu1 }
 0x442   : > { %v2909_v59 = vmul.f32 0.35355338, %v877_v57  ;;  %v2911_v60 = vmul.f32 0.35355338, %v907_v58  ;;  %v1011_v58 = vsel %vm992_vm15, %v2960_v52, -inf }
 0x444   : > { %v1020_v63 = vsel %vm992_vm15, %v2909_v59, -inf  ;;  %v1023_v0 = vsel %vm992_vm15, %v2911_v60, -inf }
 0x445   : > { %1000 = vmax.xlane.f32.xlu0 %v999_v62  ;;  %1021 = vmax.xlane.f32.xlu2 %v1020_v63  ;;  %v2967_v63 = vmul.f32 0.35355338, %v939_v11 }
 0x446   : > { %1024 = vmax.xlane.f32.xlu1 %v1023_v0 }
 0x447   : > { %v1029_v2 = vsel %vm992_vm15, %v2967_v63, -inf }
 0x449   : > { %v909_v5 = vpop.f32.mrf.mxu1 }
 0x44a   : > { %v2923_v6 = vmul.f32 0.35355338, %v909_v5 }
 0x44c   : > { %v1026_v44 = vsel %vm992_vm15, %v2923_v6, -inf }
 0x44d   : > { %1009 = vmax.xlane.f32.xlu2 %v1008_v12  ;;  %1027 = vmax.xlane.f32.xlu0 %v1026_v44  ;;  %v973_v12 = vpop.f32.mrf.mxu3 }
 0x44e   : > { %1006 = vmax.xlane.f32.xlu1 %v1005_v8  ;;  %v2977_v8 = vmul.f32 0.35355338, %v973_v12 }
 0x455   : > { %1003 = vmax.xlane.f32.xlu2 %v1002_v14  ;;  %1093 = vadd.xlane.f32.xlu0 %v1092_v15 }
 0x458   : > { %v508_v21 = vpop.xlane.xlu2 %507 }
 0x459   : > { %v510_v7 = vmul.f32 %v508_v21, %v2755_v33 }
 0x45b   : > { %v512_v22 = vadd.f32 1e-05, %v510_v7 }
 0x45d   : > { %2299 = vrsqrt.f32 %v512_v22  ;;  %1036 = vmax.xlane.f32.xlu2 %v1035_v23  ;;  %1015 = vmax.xlane.f32.xlu0 %v1014_v13  ;;  %vm529_vm2 = vweird.f32 %v512_v22 }
 0x45f   : > { %v505_v25 = vpop.xlane.xlu0 %504 }
 0x460   : > { %v509_v27 = vmul.f32 %v505_v25, %v2755_v33  ;;  %v995_v28 = vpop.xlane.xlu2 %994 }
 0x461   : > { %v1041_v29 = vsub.f32 %v2894_v36, %v995_v28 }
 0x462   : > { %v511_v30 = vadd.f32 1e-05, %v509_v27 }
 0x463   : > { %v2300_v32 = vpop.eup %2299  ;;  %v1057_v34 = vmul.f32 1.442695, %v1041_v29 }
 0x464   : > { %v524_v35 = vmul.f32 %v2300_v32, %v512_v22  ;;  %2301 = vrsqrt.f32 %v511_v30  ;;  %vm530_vm1 = vweird.f32 %v2300_v32  ;;  %vm519_vm5 = vweird.f32 %v511_v30 }
 0x465   : > { %2303 = vpow2.f32 %v1057_v34  ;;  %1033 = vmax.xlane.f32.xlu0 %v1032_v37  ;;  %vm531_vm3 = vmor %vm529_vm2, %vm530_vm1 }
 0x466   : > { %v525_v39 = vmul.f32 %v2300_v32, %v524_v35 }
 0x468   : > { %v526_v41 = vmul.f32 0.5, %v525_v39 }
 0x46a   : > { %v2302_v42 = vpop.eup %2301  ;;  %v527_v43 = vsub.f32 1.5, %v526_v41 }
 0x46b   : > { %v2954_v46 = vpop.eup %2303  ;;  %v514_v33 = vmul.f32 %v2302_v42, %v511_v30  ;;  %vm520_vm4 = vweird.f32 %v2302_v42 }
 0x46c   : > { %v528_v16 = vmul.f32 %v2300_v32, %v527_v43  ;;  %v1089_v36 = vsel %vm992_vm15, %v2954_v46, 0.0  ;;  %vm521_vm6 = vmor %vm519_vm5, %vm520_vm4 }
 0x46d   : > { %v515_v40 = vmul.f32 %v2302_v42, %v514_v33  ;;  %1090 = vadd.xlane.f32.xlu1 %v1089_v36 }
 0x46e   : > { %v532_v47 = vsel %vm531_vm3, %v2300_v32, %v528_v16 }
 0x46f   : > { %v534_v48 = vmul.f32 %v532_v47, %v2885_v38  ;;  %v516_v49 = vmul.f32 0.5, %v515_v40 }
 0x471   : > { %v517_v18 = vsub.f32 1.5, %v516_v49  ;;  %v536_v55 = vmul.f32 %v534_v48, %v2751_v31 }
 0x473   : > { %v518_v57 = vmul.f32 %v2302_v42, %v517_v18  ;;  %v538_v62 = vadd.f32 %v536_v55, %v2784_v56 }
 0x475   : > { %v522_v61 = vsel %vm521_vm6, %v2302_v42, %v518_v57  ;;  %1012 = vmax.xlane.f32.xlu1 %v1011_v58  ;;  %v704_v1 = vpack.c.bf16 %v538_v62, %v538_v62 }
 0x476   : > { %v533_v38 = vmul.f32 %v522_v61, %v2892_v45 }
 0x477   : > { %v1401_v45 = vunpack.c.l.b16 %v704_v1 }
 0x478   : > { %v535_v54 = vmul.f32 %v533_v38, %v2751_v31  ;;  %v1038_v31 = vsel %vm992_vm15, %v2977_v8, -inf }
 0x47a   : > { %v537_v0 = vadd.f32 %v535_v54, %v2784_v56 }
 0x47c   : > { %v2973_v5 = vpack.i.bf16 %v538_v62, %v537_v0  ;;  %v703_v50 = vpack.c.bf16 %v537_v0, %v537_v0 }
 0x47d   : > { %1030 = vmax.xlane.f32.xlu1 %v1029_v2 }
 0x47e   : > { %2258 = vrot.lane.b32.xlu0 %v2973_v5, %s2572_s23  ;;  %v1400_v44 = vunpack.c.l.b16 %v703_v50 }
 0x480   : > { %v1402_v11 = vpack.c.b16 %v1401_v45, %v1400_v44 }
 0x482   : > { %1414 = vmatpush.bf16.msra.mxu0 %v1402_v11 }
 0x485   : > { %1039 = vmax.xlane.f32.xlu1 %v1038_v31 }
 0x486   : > { %2263 = vrot.lane.b32.xlu0 %v2973_v5, %s2571_s26  ;;  %s2502_s26 = scalar_lea.hbm %s2501_s12, 8 }
 0x487   : > { %p2503_p1 = scmp.ne.s32.totalorder %s2501_s12, %s2502_s26 }
 0x489   : > { %p2504_p4 = pnand %p2503_p1, %p2689_p3 }
 0x48b   : > { %p2505_p8 = pneg %p2504_p4 }
 0x4b0   : > { %v1019_v56 = vpop.xlane.xlu0 %1018 }
 0x4b8   : > { %v1001_v14 = vpop.xlane.xlu0 %1000  ;;  %v1022_v15 = vpop.xlane.xlu2 %1021 }
 0x4b9   : > { %v2983_v17 = vpop.xlane.xlu1 %1024  ;;  %v1043_v25 = vsub.f32 %v2905_v53, %v1001_v14 }
 0x4bb   : > { %v1061_v28 = vmul.f32 1.442695, %v1043_v25 }
 0x4c0   : > { %v1010_v21 = vpop.xlane.xlu2 %1009  ;;  %v1028_v13 = vpop.xlane.xlu0 %1027 }
 0x4c1   : > { %v1046_v7 = vsub.f32 %v2919_v3, %v1010_v21  ;;  %v1007_v22 = vpop.xlane.xlu1 %1006  ;;  %v1049_v3 = vsub.f32 %v2901_v51, %v1019_v56  ;;  %v1050_v51 = vsub.f32 %v2909_v59, %v1022_v15  ;;  %v1052_v47 = vsub.f32 %v2923_v6, %v1028_v13 }
 0x4c2   : > { %v1045_v23 = vsub.f32 %v2921_v4, %v1007_v22 }
 0x4c3   : > { %v1067_v24 = vmul.f32 1.442695, %v1046_v7  ;;  %v1075_v16 = vmul.f32 1.442695, %v1050_v51  ;;  %v1079_v18 = vmul.f32 1.442695, %v1052_v47 }
 0x4c4   : > { %v1065_v27 = vmul.f32 1.442695, %v1045_v23 }
 0x4c5   : > { %2305 = vpow2.f32 %v1067_v24 }
 0x4c6   : > { %2307 = vpow2.f32 %v1065_v27 }
 0x4c7   : > { %2309 = vpow2.f32 %v1061_v28 }
 0x4c8   : > { %v1004_v29 = vpop.xlane.xlu2 %1003  ;;  %v1094_v4 = vpop.xlane.xlu0 %1093 }
 0x4c9   : > { %v1044_v30 = vsub.f32 %v2931_v9, %v1004_v29  ;;  %v1073_v9 = vmul.f32 1.442695, %v1049_v3  ;;  %v1162_v38 = vand.u32 2147483648, %v1094_v4  ;;  %vm1156_vm8 = vweird.f32 %v1094_v4 }
 0x4ca   : > { %v1160_v54 = vand.u32 2147483647, %v1094_v4 }
 0x4cb   : > { %v2989_v32 = vpop.eup %2305  ;;  %v1063_v34 = vmul.f32 1.442695, %v1044_v30  ;;  %v1163_v45 = vor.u32 1.1754944e-38, %v1162_v38 }
 0x4cc   : > { %v2991_v35 = vpop.eup %2307  ;;  %v1104_v37 = vsel %vm992_vm15, %v2989_v32, 0.0  ;;  %vm1161_vm10 = vcmp.eq.f32.partialorder %v1160_v54, 8.507059e+37 }
 0x4cd   : > { %2311 = vpow2.f32 %v1063_v34  ;;  %v1101_v53 = vsel %vm992_vm15, %v2991_v35, 0.0  ;;  %1105 = vadd.xlane.f32.xlu1 %v1104_v37  ;;  %v2998_v39 = vpop.eup %2309 }
 0x4ce   : > { %1102 = vadd.xlane.f32.xlu2 %v1101_v53  ;;  %2313 = vrcp.f32 %v1094_v4  ;;  %v1095_v33 = vsel %vm992_vm15, %v2998_v39, 0.0 }
 0x4cf   : > { %2315 = vpow2.f32 %v1073_v9 }
 0x4d0   : > { %2317 = vpow2.f32 %v1075_v16  ;;  %v1016_v49 = vpop.xlane.xlu0 %1015  ;;  %v1037_v24 = vpop.xlane.xlu2 %1036 }
 0x4d1   : > { %v1048_v61 = vsub.f32 %v2939_v19, %v1016_v49  ;;  %v1055_v51 = vsub.f32 %v2941_v20, %v1037_v24 }
 0x4d3   : > { %v3000_v41 = vpop.eup %2311  ;;  %v1071_v1 = vmul.f32 1.442695, %v1048_v61  ;;  %v1085_v49 = vmul.f32 1.442695, %v1055_v51 }
 0x4d4   : > { %v1098_v42 = vsel %vm992_vm15, %v3000_v41, 0.0  ;;  %v2314_v43 = vpop.eup %2313 }
 0x4d5   : > { %1099 = vadd.xlane.f32.xlu1 %v1098_v42  ;;  %v1152_v36 = vmul.f32 %v2314_v43, %v1094_v4  ;;  %v3007_v40 = vpop.eup %2315  ;;  %vm1157_vm7 = vweird.f32 %v2314_v43 }
 0x4d6   : > { %1096 = vadd.xlane.f32.xlu2 %v1095_v33  ;;  %v1113_v59 = vsel %vm992_vm15, %v3007_v40, 0.0  ;;  %v3012_v58 = vpop.eup %2317  ;;  %vm1158_vm9 = vmor %vm1156_vm8, %vm1157_vm7 }
 0x4d7   : > { %v1153_v48 = vsub.f32 1.0, %v1152_v36  ;;  %v1116_v6 = vsel %vm992_vm15, %v3012_v58, 0.0 }
 0x4d8   : > { %v1034_v50 = vpop.xlane.xlu0 %1033 }
 0x4d9   : > { %v1154_v55 = vmul.f32 %v2314_v43, %v1153_v48  ;;  %v1054_v21 = vsub.f32 %v2948_v26, %v1034_v50 }
 0x4db   : > { %v1155_v62 = vadd.f32 %v2314_v43, %v1154_v55  ;;  %v1083_v27 = vmul.f32 1.442695, %v1054_v21 }
 0x4dd   : > { %v1159_v2 = vsel %vm1158_vm9, %v2314_v43, %v1155_v62 }
 0x4de   : > { %1114 = vadd.xlane.f32.xlu2 %v1113_v59  ;;  %v1164_v56 = vsel %vm1161_vm10, %v1163_v45, %v1159_v2 }
 0x4df   : > { %v1362_v13 = vmul.f32 %v2933_v10, %v1164_v56 }
 0x4e0   : > { %v1091_v57 = vpop.xlane.xlu1 %1090 }
 0x4e1   : > { %2319 = vrcp.f32 %v1091_v57  ;;  %v1148_v14 = vand.u32 2147483648, %v1091_v57  ;;  %v1146_v22 = vand.u32 2147483647, %v1091_v57  ;;  %vm1142_vm12 = vweird.f32 %v1091_v57 }
 0x4e2   : > { %2321 = vpow2.f32 %v1079_v18  ;;  %v1378_v37 = vpack.c.bf16 %v1362_v13, %v1362_v13 }
 0x4e3   : > { %2323 = vpow2.f32 %v1071_v1  ;;  %v1149_v25 = vor.u32 1.1754944e-38, %v1148_v14  ;;  %vm1147_vm1 = vcmp.eq.f32.partialorder %v1146_v22, 8.507059e+37 }
 0x4e6   : > { %1117 = vadd.xlane.f32.xlu2 %v1116_v6 }
 0x4e7   : > { %v2320_v0 = vpop.eup %2319 }
 0x4e8   : > { %v1138_v12 = vmul.f32 %v2320_v0, %v1091_v57  ;;  %v1013_v44 = vpop.xlane.xlu1 %1012  ;;  %v3018_v11 = vpop.eup %2321  ;;  %vm1143_vm11 = vweird.f32 %v2320_v0 }
 0x4e9   : > { %v1047_v19 = vsub.f32 %v2960_v52, %v1013_v44  ;;  %v1122_v23 = vsel %vm992_vm15, %v3018_v11, 0.0  ;;  %vm1144_vm13 = vmor %vm1142_vm12, %vm1143_vm11  ;;  %v3026_v30 = vpop.eup %2323 }
 0x4ea   : > { %v1139_v31 = vsub.f32 1.0, %v1138_v12  ;;  %v1110_v48 = vsel %vm992_vm15, %v3026_v30, 0.0 }
 0x4eb   : > { %v1069_v15 = vmul.f32 1.442695, %v1047_v19 }
 0x4ec   : > { %v1140_v7 = vmul.f32 %v2320_v0, %v1139_v31 }
 0x4ed   : > { %2325 = vpow2.f32 %v1069_v15  ;;  %v1051_v15 = vsub.f32 %v2911_v60, %v2983_v17 }
 0x4ee   : > { %v1141_v52 = vadd.f32 %v2320_v0, %v1140_v7  ;;  %1123 = vadd.xlane.f32.xlu2 %v1122_v23  ;;  %2253 = vrot.lane.b32.xlu1 %v2973_v5, %s2573_s24  ;;  %2327 = vpow2.f32 %v1083_v27 }
 0x4ef   : > { %v1077_v21 = vmul.f32 1.442695, %v1051_v15 }
 0x4f0   : > { %v1145_v26 = vsel %vm1144_vm13, %v2320_v0, %v1141_v52  ;;  %v1031_v28 = vpop.xlane.xlu1 %1030  ;;  %v2259_v29 = vpop.permute.xlu0 %2258 }
 0x4f1   : > { %v1150_v34 = vsel %vm1147_vm1, %v1149_v25, %v1145_v26  ;;  %v1053_v3 = vsub.f32 %v2967_v63, %v1031_v28  ;;  %v2261_v10 = vunpack.i.h.bf16 %v2259_v29  ;;  %v2260_v4 = vunpack.i.l.bf16 %v2259_v29 }
 0x4f2   : > { %v1361_v53 = vmul.f32 %v2954_v46, %v1150_v34  ;;  %v1396_v46 = vunpack.c.l.b16 %v1378_v37 }
 0x4f3   : > { %v3030_v9 = vpop.eup %2325  ;;  %v1081_v42 = vmul.f32 1.442695, %v1053_v3  ;;  %v710_v43 = vpack.c.bf16 %v2261_v10, %v2261_v10  ;;  %v709_v33 = vpack.c.bf16 %v2260_v4, %v2260_v4 }
 0x4f4   : > { %v1377_v16 = vpack.c.bf16 %v1361_v53, %v1361_v53  ;;  %v1107_v36 = vsel %vm992_vm15, %v3030_v9, 0.0  ;;  %v3038_v6 = vpop.eup %2327 }
 0x4f5   : > { %2329 = vpow2.f32 %v1081_v42  ;;  %v1485_v47 = vunpack.c.l.b16 %v710_v43  ;;  %v1484_v63 = vunpack.c.l.b16 %v709_v33  ;;  %1108 = vadd.xlane.f32.xlu0 %v1107_v36 }
 0x4f6   : > { %v1395_v59 = vunpack.c.l.b16 %v1377_v16  ;;  %1111 = vadd.xlane.f32.xlu2 %v1110_v48  ;;  %2331 = vpow2.f32 %v1085_v49 }
 0x4f7   : > { %v1486_v20 = vpack.c.b16 %v1485_v47, %v1484_v63 }
 0x4f8   : > { %v1040_v18 = vpop.xlane.xlu1 %1039  ;;  %v2264_v55 = vpop.permute.xlu0 %2263  ;;  %v1397_v57 = vpack.c.b16 %v1396_v46, %v1395_v59 }
 0x4f9   : > { %v1056_v61 = vsub.f32 %v2977_v8, %v1040_v18  ;;  %v2266_v62 = vunpack.i.h.bf16 %v2264_v55  ;;  %v2265_v38 = vunpack.i.l.bf16 %v2264_v55  ;;  %1498 = vmatpush.bf16.msrb.mxu3 %v1486_v20  ;;  %v1128_v8 = vsel %vm992_vm15, %v3038_v6, 0.0 }
 0x4fa   : > { %2059 = vmatmul.msk.bf16.vlgmr.msra.gmra.mxu0 %vm992_vm15, %v1397_v57 }
 0x4fb   : > { %v3041_v54 = vpop.eup %2329  ;;  %v1087_v0 = vmul.f32 1.442695, %v1056_v61  ;;  %v706_v1 = vpack.c.bf16 %v2266_v62, %v2266_v62  ;;  %v705_v2 = vpack.c.bf16 %v2265_v38, %v2265_v38 }
 0x4fc   : > { %v1125_v50 = vsel %vm992_vm15, %v3041_v54, 0.0  ;;  %v3047_v19 = vpop.eup %2331 }
 0x4fd   : > { %2333 = vpow2.f32 %v1087_v0  ;;  %v1429_v12 = vunpack.c.l.b16 %v706_v1  ;;  %v1428_v44 = vunpack.c.l.b16 %v705_v2  ;;  %1126 = vadd.xlane.f32.xlu0 %v1125_v50  ;;  %v1131_v56 = vsel %vm992_vm15, %v3047_v19, 0.0 }
 0x4fe   : > { %1129 = vadd.xlane.f32.xlu2 %v1128_v8  ;;  %2335 = vpow2.f32 %v1077_v21 }
 0x4ff   : > { %v1430_v45 = vpack.c.b16 %v1429_v12, %v1428_v44 }
 0x501   : > { %1442 = vmatpush.bf16.msra.mxu1 %v1430_v45 }
 0x503   : > { %v3049_v31 = vpop.eup %2333 }
 0x504   : > { %v1134_v14 = vsel %vm992_vm15, %v3049_v31, 0.0  ;;  %v3057_v7 = vpop.eup %2335 }
 0x505   : > { %1132 = vadd.xlane.f32.xlu0 %v1131_v56  ;;  %v1119_v22 = vsel %vm992_vm15, %v3057_v7, 0.0 }
 0x506   : > { %1135 = vadd.xlane.f32.xlu2 %v1134_v14 }
 0x518   : > { %1120 = vadd.xlane.f32.xlu1 %v1119_v22 }
 0x519   : > { %2273 = vrot.lane.b32.xlu0 %v2973_v5, %s2575_s13 }
 0x51e   : > { %2268 = vrot.lane.b32.xlu2 %v2973_v5, %s2574_s11  ;;  %s2506_s11 = scalar_lea.hbm %s3352_s4, 16 }
 0x51f   : > { %p2508_p9 = scmp.lt.s32.totalorder %s2506_s11, %s2502_s26 }
 0x521   : > { %2278 = vrot.lane.b32.xlu0 %v2973_v5, %s2577_s20  ;;  %p2509_p2 = por %p2508_p9, %p2507_p11 }
 0x523   : > { %p2510_p10 = pnand %p2509_p2, %p2505_p8 }
 0x529   : > { %2283 = vrot.lane.b32.xlu0 %v2973_v5, %s2576_s14 }
 0x540   : > { %v3069_v60 = vpop.xlane.xlu1 %1105 }
 0x541   : > { %v3071_v17 = vpop.xlane.xlu2 %1102  ;;  %2337 = vrcp.f32 %v3069_v60  ;;  %vm1212_vm2 = vweird.f32 %v3069_v60  ;;  %v1216_v4 = vand.u32 2147483647, %v3069_v60  ;;  %v1218_v37 = vand.u32 2147483648, %v3069_v60 }
 0x542   : > { %2339 = vrcp.f32 %v3071_v17  ;;  %vm1198_vm3 = vweird.f32 %v3071_v17  ;;  %v1204_v55 = vand.u32 2147483648, %v3071_v17  ;;  %v1202_v62 = vand.u32 2147483647, %v3071_v17 }
 0x543   : > { %v1219_v14 = vor.u32 1.1754944e-38, %v1218_v37 }
 0x544   : > { %v1205_v56 = vor.u32 1.1754944e-38, %v1204_v55 }
 0x547   : > { %v3075_v23 = vpop.eup %2337 }
 0x548   : > { %v3077_v13 = vpop.eup %2339  ;;  %v1100_v52 = vpop.xlane.xlu1 %1099  ;;  %v1208_v5 = vmul.f32 %v3075_v23, %v3069_v60  ;;  %vm1213_vm5 = vweird.f32 %v3075_v23 }
 0x549   : > { %v1097_v24 = vpop.xlane.xlu2 %1096  ;;  %2341 = vrcp.f32 %v1100_v52  ;;  %v1194_v25 = vmul.f32 %v3077_v13, %v3071_v17  ;;  %v1190_v33 = vand.u32 2147483648, %v1100_v52  ;;  %v1188_v47 = vand.u32 2147483647, %v1100_v52  ;;  %vm3101_vm13 = vmor %vm1212_vm2, %vm1213_vm5 }
 0x54a   : > { %2343 = vrcp.f32 %v1097_v24  ;;  %v1209_v28 = vsub.f32 1.0, %v1208_v5  ;;  %v1176_v16 = vand.u32 2147483648, %v1097_v24  ;;  %v1174_v48 = vand.u32 2147483647, %v1097_v24 }
 0x54b   : > { %v1195_v26 = vsub.f32 1.0, %v1194_v25  ;;  %vm1199_vm7 = vweird.f32 %v3077_v13  ;;  %vm1170_vm8 = vweird.f32 %v1097_v24  ;;  %vm1184_vm9 = vweird.f32 %v1100_v52 }
 0x54c   : > { %v1210_v42 = vmul.f32 %v3075_v23, %v1209_v28  ;;  %v1191_v18 = vor.u32 1.1754944e-38, %v1190_v33  ;;  %v1177_v57 = vor.u32 1.1754944e-38, %v1176_v16  ;;  %vm1189_vm12 = vcmp.eq.f32.partialorder %v1188_v47, 8.507059e+37 }
 0x54d   : > { %v1196_v51 = vmul.f32 %v3077_v13, %v1195_v26  ;;  %vm1175_vm1 = vcmp.eq.f32.partialorder %v1174_v48, 8.507059e+37  ;;  %vm1203_vm2 = vcmp.eq.f32.partialorder %v1202_v62, 8.507059e+37  ;;  %vm1217_vm5 = vcmp.eq.f32.partialorder %v1216_v4, 8.507059e+37 }
 0x54e   : > { %v1211_v49 = vadd.f32 %v3075_v23, %v1210_v42 }
 0x54f   : > { %v2342_v27 = vpop.eup %2341  ;;  %v1197_v59 = vadd.f32 %v3077_v13, %v1196_v51 }
 0x550   : > { %v2344_v29 = vpop.eup %2343  ;;  %v1180_v34 = vmul.f32 %v2342_v27, %v1100_v52  ;;  %vm1185_vm4 = vweird.f32 %v2342_v27  ;;  %v1215_v8 = vsel %vm3101_vm13, %v3075_v23, %v1211_v49 }
 0x551   : > { %v1166_v3 = vmul.f32 %v2344_v29, %v1097_v24  ;;  %v3084_v10 = vpop.xlane.xlu2 %1114  ;;  %vm1171_vm6 = vweird.f32 %v2344_v29  ;;  %vm1186_vm10 = vmor %vm1184_vm9, %vm1185_vm4  ;;  %v1220_v60 = vsel %vm1217_vm5, %v1219_v14, %v1215_v8 }
 0x552   : > { %v1181_v53 = vsub.f32 1.0, %v1180_v34  ;;  %vm1172_vm11 = vmor %vm1170_vm8, %vm1171_vm6  ;;  %2345 = vrcp.f32 %v3084_v10  ;;  %v1258_v49 = vand.u32 2147483647, %v3084_v10  ;;  %vm1254_vm5 = vweird.f32 %v3084_v10 }
 0x553   : > { %v1167_v43 = vsub.f32 1.0, %v1166_v3  ;;  %vm1200_vm4 = vmor %vm1198_vm3, %vm1199_vm7 }
 0x554   : > { %v1182_v36 = vmul.f32 %v2342_v27, %v1181_v53  ;;  %v1201_v44 = vsel %vm1200_vm4, %v3077_v13, %v1197_v59  ;;  %v1366_v13 = vmul.f32 %v2989_v32, %v1220_v60 }
 0x555   : > { %v1168_v63 = vmul.f32 %v2344_v29, %v1167_v43  ;;  %v1206_v22 = vsel %vm1203_vm2, %v1205_v56, %v1201_v44 }
 0x556   : > { %v1183_v46 = vadd.f32 %v2342_v27, %v1182_v36  ;;  %v1382_v28 = vpack.c.bf16 %v1366_v13, %v1366_v13  ;;  %v1260_v36 = vand.u32 2147483648, %v3084_v10 }
 0x557   : > { %v1169_v20 = vadd.f32 %v2344_v29, %v1168_v63 }
 0x558   : > { %v1187_v61 = vsel %vm1186_vm10, %v2342_v27, %v1183_v46  ;;  %v3124_v3 = vpop.eup %2345  ;;  %v1452_v37 = vunpack.c.l.b16 %v1382_v28 }
 0x559   : > { %v1173_v0 = vsel %vm1172_vm11, %v2344_v29, %v1169_v20  ;;  %v1192_v1 = vsel %vm1189_vm12, %v1191_v18, %v1187_v61  ;;  %v3105_v2 = vpop.xlane.xlu2 %1117  ;;  %v1250_v51 = vmul.f32 %v3124_v3, %v3084_v10  ;;  %v3142_v61 = vor.u32 1.1754944e-38, %v1260_v36 }
 0x55a   : > { %v1178_v50 = vsel %vm1175_vm1, %v1177_v57, %v1173_v0  ;;  %v1364_v12 = vmul.f32 %v3000_v41, %v1192_v1  ;;  %v1365_v41 = vmul.f32 %v2991_v35, %v1206_v22  ;;  %2347 = vrcp.f32 %v3105_v2 }
 0x55b   : > { %v1363_v45 = vmul.f32 %v2998_v39, %v1178_v50  ;;  %v1251_v16 = vsub.f32 1.0, %v1250_v51  ;;  %v1274_v20 = vand.u32 2147483648, %v3105_v2  ;;  %v1272_v0 = vand.u32 2147483647, %v3105_v2 }
 0x55c   : > { %v1380_v15 = vpack.c.bf16 %v1364_v12, %v1364_v12  ;;  %v1381_v26 = vpack.c.bf16 %v1365_v41, %v1365_v41  ;;  %vm1255_vm1 = vweird.f32 %v3124_v3 }
 0x55d   : > { %v1379_v21 = vpack.c.bf16 %v1363_v45, %v1363_v45  ;;  %v1252_v57 = vmul.f32 %v3124_v3, %v1251_v16  ;;  %v3146_v45 = vor.u32 1.1754944e-38, %v1274_v20 }
 0x55e   : > { %v1424_v52 = vunpack.c.l.b16 %v1380_v15  ;;  %v1451_v4 = vunpack.c.l.b16 %v1381_v26 }
 0x55f   : > { %v1423_v17 = vunpack.c.l.b16 %v1379_v21  ;;  %v3149_v15 = vadd.f32 %v3124_v3, %v1252_v57 }
 0x560   : > { %v2254_v24 = vpop.permute.xlu1 %2253  ;;  %v3128_v43 = vpop.eup %2347  ;;  %v1453_v33 = vpack.c.b16 %v1452_v37, %v1451_v4 }
 0x561   : > { %v3120_v23 = vpop.xlane.xlu2 %1123  ;;  %v2256_v39 = vunpack.i.h.bf16 %v2254_v24  ;;  %v2255_v5 = vunpack.i.l.bf16 %v2254_v24  ;;  %v1425_v27 = vpack.c.b16 %v1424_v52, %v1423_v17  ;;  %v1264_v63 = vmul.f32 %v3128_v43, %v3105_v2 }
 0x563   : > { %v708_v25 = vpack.c.bf16 %v2256_v39, %v2256_v39  ;;  %v707_v34 = vpack.c.bf16 %v2255_v5, %v2255_v5  ;;  %2060 = vmatmul.msk.bf16.vlgmr.msra.gmra.mxu1 %vm992_vm15, %v1425_v27  ;;  %v1265_v38 = vsub.f32 1.0, %v1264_v63 }
 0x565   : > { %v1457_v29 = vunpack.c.l.b16 %v708_v25  ;;  %v1456_v35 = vunpack.c.l.b16 %v707_v34  ;;  %v1266_v60 = vmul.f32 %v3128_v43, %v1265_v38 }
 0x567   : > { %v1458_v42 = vpack.c.b16 %v1457_v29, %v1456_v35 }
 0x568   : > { %v1109_v32 = vpop.xlane.xlu0 %1108 }
 0x569   : > { %v1112_v53 = vpop.xlane.xlu2 %1111  ;;  %2349 = vrcp.f32 %v1109_v32  ;;  %1470 = vmatpush.bf16.msrb.mxu2 %v1458_v42  ;;  %v1232_v50 = vand.u32 2147483648, %v1109_v32  ;;  %v1230_v8 = vand.u32 2147483647, %v1109_v32  ;;  %vm1226_vm7 = vweird.f32 %v1109_v32 }
 0x56a   : > { %2351 = vrcp.f32 %v1112_v53  ;;  %v1246_v12 = vand.u32 2147483648, %v1112_v53  ;;  %v1244_v14 = vand.u32 2147483647, %v1112_v53  ;;  %vm1240_vm8 = vweird.f32 %v1112_v53 }
 0x56b   : > { %v1233_v52 = vor.u32 1.1754944e-38, %v1232_v50  ;;  %vm1231_vm11 = vcmp.eq.f32.partialorder %v1230_v8, 8.507059e+37 }
 0x56c   : > { %2061 = vmatmul.msk.bf16.vlgmr.msrb.gmra.mxu2 %vm992_vm15, %v1453_v33  ;;  %v1247_v41 = vor.u32 1.1754944e-38, %v1246_v12  ;;  %vm1245_vm12 = vcmp.eq.f32.partialorder %v1244_v14, 8.507059e+37 }
 0x56f   : > { %v2350_v47 = vpop.eup %2349 }
 0x570   : > { %v2352_v48 = vpop.eup %2351  ;;  %v1222_v46 = vmul.f32 %v2350_v47, %v1109_v32  ;;  %v3134_v59 = vpop.xlane.xlu0 %1126  ;;  %vm1227_vm3 = vweird.f32 %v2350_v47 }
 0x571   : > { %v1236_v18 = vmul.f32 %v2352_v48, %v1112_v53  ;;  %v3138_v55 = vpop.xlane.xlu2 %1129  ;;  %2353 = vrcp.f32 %v3134_v59  ;;  %vm1241_vm6 = vweird.f32 %v2352_v48  ;;  %vm1228_vm9 = vmor %vm1226_vm7, %vm1227_vm3  ;;  %v1316_v53 = vand.u32 2147483648, %v3134_v59 }
 0x572   : > { %v1223_v62 = vsub.f32 1.0, %v1222_v46  ;;  %2355 = vrcp.f32 %v3138_v55  ;;  %vm1242_vm10 = vmor %vm1240_vm8, %vm1241_vm6  ;;  %v1328_v34 = vand.u32 2147483647, %v3138_v55  ;;  %v1330_v42 = vand.u32 2147483648, %v3138_v55 }
 0x573   : > { %v1237_v1 = vsub.f32 1.0, %v1236_v18  ;;  %2357 = vrcp.f32 %v3120_v23  ;;  %vm1310_vm2 = vweird.f32 %v3134_v59  ;;  %vm1269_vm3 = vweird.f32 %v3128_v43 }
 0x574   : > { %v1224_v44 = vmul.f32 %v2350_v47, %v1223_v62  ;;  %vm1324_vm6 = vweird.f32 %v3138_v55  ;;  %v1317_v20 = vor.u32 1.1754944e-38, %v1316_v53  ;;  %v1331_v18 = vor.u32 1.1754944e-38, %v1330_v42 }
 0x575   : > { %v1238_v56 = vmul.f32 %v2352_v48, %v1237_v1 }
 0x576   : > { %v1225_v21 = vadd.f32 %v2350_v47, %v1224_v44 }
 0x577   : > { %v2354_v22 = vpop.eup %2353  ;;  %v1239_v17 = vadd.f32 %v2352_v48, %v1238_v56 }
 0x578   : > { %v2356_v24 = vpop.eup %2355  ;;  %v1229_v13 = vsel %vm1228_vm9, %v2350_v47, %v1225_v21  ;;  %v1306_v39 = vmul.f32 %v2354_v22, %v3134_v59  ;;  %v3159_v32 = vpop.xlane.xlu0 %1132  ;;  %vm1311_vm13 = vweird.f32 %v2354_v22  ;;  %vm1329_vm9 = vcmp.eq.f32.partialorder %v1328_v34, 8.507059e+37 }
 0x579   : > { %v1243_v25 = vsel %vm1242_vm10, %v2352_v48, %v1239_v17  ;;  %v1234_v5 = vsel %vm1231_vm11, %v1233_v52, %v1229_v13  ;;  %v1320_v27 = vmul.f32 %v2356_v24, %v3138_v55  ;;  %v3155_v26 = vpop.xlane.xlu2 %1135  ;;  %v3164_v51 = vpop.eup %2357  ;;  %vm1325_vm4 = vweird.f32 %v2356_v24  ;;  %vm1312_vm7 = vmor %vm1310_vm2, %vm1311_vm13 }
 0x57a   : > { %v1248_v28 = vsel %vm1245_vm12, %v1247_v41, %v1243_v25  ;;  %v1367_v29 = vmul.f32 %v3030_v9, %v1234_v5  ;;  %v1307_v35 = vsub.f32 1.0, %v1306_v39  ;;  %2359 = vrcp.f32 %v3155_v26  ;;  %vm1326_vm8 = vmor %vm1324_vm6, %vm1325_vm4 }
 0x57b   : > { %v1368_v4 = vmul.f32 %v3026_v30, %v1248_v28  ;;  %v1321_v37 = vsub.f32 1.0, %v1320_v27  ;;  %v1314_v9 = vand.u32 2147483647, %v3134_v59  ;;  %2361 = vrcp.f32 %v3159_v32 }
 0x57c   : > { %v1308_v33 = vmul.f32 %v2354_v22, %v1307_v35  ;;  %v1383_v16 = vpack.c.bf16 %v1367_v29, %v1367_v29  ;;  %v3171_v30 = vadd.f32 %v3128_v43, %v1266_v60  ;;  %v3178_v48 = vmul.f32 %v3164_v51, %v3120_v23 }
 0x57d   : > { %v1322_v36 = vmul.f32 %v2356_v24, %v1321_v37  ;;  %v1384_v47 = vpack.c.bf16 %v1368_v4, %v1368_v4  ;;  %vm1315_vm10 = vcmp.eq.f32.partialorder %v1314_v9, 8.507059e+37  ;;  %vm1268_vm11 = vweird.f32 %v3105_v2 }
 0x57e   : > { %v1309_v63 = vadd.f32 %v2354_v22, %v1308_v33  ;;  %v1479_v62 = vunpack.c.l.b16 %v1383_v16  ;;  %vm1352_vm12 = vweird.f32 %v3155_v26  ;;  %v1356_v21 = vand.u32 2147483647, %v3155_v26 }
 0x57f   : > { %v1323_v46 = vadd.f32 %v2356_v24, %v1322_v36  ;;  %v1480_v12 = vunpack.c.l.b16 %v1384_v47  ;;  %vm3190_vm13 = vcmp.eq.f32.partialorder %v1258_v49, 8.507059e+37  ;;  %v1358_v41 = vand.u32 2147483648, %v3155_v26 }
 0x580   : > { %v1313_v57 = vsel %vm1312_vm7, %v2354_v22, %v1309_v63  ;;  %v2360_v59 = vpop.eup %2359  ;;  %vm3198_vm4 = vcmp.eq.f32.partialorder %v1272_v0, 8.507059e+37  ;;  %v1342_v39 = vand.u32 2147483647, %v3159_v32  ;;  %v1344_v29 = vand.u32 2147483648, %v3159_v32  ;;  %vm3208_vm7 = vmor %vm1254_vm5, %vm1255_vm1  ;;  %v1416_v0 = vpop.f32.mrf.mxu0 }
 0x581   : > { %v1327_v38 = vsel %vm1326_vm8, %v2356_v24, %v1323_v46  ;;  %v1318_v1 = vsel %vm1315_vm10, %v1317_v20, %v1313_v57  ;;  %v2269_v50 = vpop.permute.xlu2 %2268  ;;  %v1348_v8 = vmul.f32 %v2360_v59, %v3155_v26  ;;  %v2362_v56 = vpop.eup %2361  ;;  %vm1353_vm2 = vweird.f32 %v2360_v59  ;;  %vm3225_vm5 = vmor %vm1268_vm11, %vm1269_vm3 }
 0x582   : > { %v1332_v44 = vsel %vm1329_vm9, %v1331_v18, %v1327_v38  ;;  %v1373_v55 = vmul.f32 %v3041_v54, %v1318_v1  ;;  %v2271_v22 = vunpack.i.h.bf16 %v2269_v50  ;;  %v2270_v60 = vunpack.i.l.bf16 %v2269_v50  ;;  %vm1354_vm1 = vmor %vm1352_vm12, %vm1353_vm2 }
 0x583   : > { %v1374_v14 = vmul.f32 %v3038_v6, %v1332_v44  ;;  %v1349_v24 = vsub.f32 1.0, %v1348_v8  ;;  %v1334_v54 = vmul.f32 %v2362_v56, %v3159_v32  ;;  %v1481_v28 = vpack.c.b16 %v1480_v12, %v1479_v62 }
 0x584   : > { %v1389_v52 = vpack.c.bf16 %v1373_v55, %v1373_v55  ;;  %v716_v25 = vpack.c.bf16 %v2271_v22, %v2271_v22  ;;  %v715_v49 = vpack.c.bf16 %v2270_v60, %v2270_v60  ;;  %vm1339_vm6 = vweird.f32 %v2362_v56 }
 0x585   : > { %v1390_v13 = vpack.c.bf16 %v1374_v14, %v1374_v14  ;;  %v1350_v5 = vmul.f32 %v2360_v59, %v1349_v24  ;;  %v1335_v27 = vsub.f32 1.0, %v1334_v54  ;;  %2062 = vmatmul.msk.bf16.vlgmr.msrb.gmra.mxu3 %vm992_vm15, %v1481_v28  ;;  %v1257_v33 = vsel %vm3208_vm7, %v3124_v3, %v3149_v15 }
 0x586   : > { %v1569_v34 = vunpack.c.l.b16 %v716_v25  ;;  %v1568_v35 = vunpack.c.l.b16 %v715_v49  ;;  %v1563_v37 = vunpack.c.l.b16 %v1389_v52  ;;  %v1293_v9 = vsub.f32 1.0, %v3178_v48 }
 0x587   : > { %v1564_v4 = vunpack.c.l.b16 %v1390_v13  ;;  %v1351_v53 = vadd.f32 %v2360_v59, %v1350_v5  ;;  %v1336_v42 = vmul.f32 %v2362_v56, %v1335_v27  ;;  %v1359_v10 = vor.u32 1.1754944e-38, %v1358_v41 }
 0x588   : > { %v1570_v16 = vpack.c.b16 %v1569_v34, %v1568_v35  ;;  %vm1357_vm8 = vcmp.eq.f32.partialorder %v1356_v21, 8.507059e+37  ;;  %vm1338_vm9 = vweird.f32 %v3159_v32  ;;  %v1271_v3 = vsel %vm3225_vm5, %v3128_v43, %v3171_v30  ;;  %v1633_v34 = vld [vmem:[#allocation8] sm:$0xf] }
 0x589   : > { %v1355_v47 = vsel %vm1354_vm1, %v2360_v59, %v1351_v53  ;;  %v1337_v63 = vadd.f32 %v2362_v56, %v1336_v42  ;;  %vm1340_vm10 = vmor %vm1338_vm9, %vm1339_vm6  ;;  %vm1343_vm12 = vcmp.eq.f32.partialorder %v1342_v39, 8.507059e+37  ;;  %v1345_v26 = vor.u32 1.1754944e-38, %v1344_v29 }
 0x58a   : > { %v1360_v15 = vsel %vm1357_vm8, %v1359_v10, %v1355_v47  ;;  %1582 = vmatpush.bf16.msra.mxu2 %v1570_v16  ;;  %v1565_v32 = vpack.c.b16 %v1564_v4, %v1563_v37  ;;  %v1262_v18 = vsel %vm3190_vm13, %v3142_v61, %v1257_v33  ;;  %v1294_v43 = vmul.f32 %v3164_v51, %v1293_v9 }
 0x58b   : > { %v3235_v2 = vpop.xlane.xlu1 %1120  ;;  %v2274_v48 = vpop.permute.xlu0 %2273  ;;  %v1376_v46 = vmul.f32 %v3049_v31, %v1360_v15  ;;  %v1341_v20 = vsel %vm1340_vm10, %v2362_v56, %v1337_v63  ;;  %v1276_v59 = vsel %vm3198_vm4, %v3146_v45, %v1271_v3  ;;  %v1300_v31 = vand.u32 2147483647, %v3120_v23 }
 0x58c   : > { %2363 = vrcp.f32 %v3235_v2  ;;  %v1346_v30 = vsel %vm1343_vm12, %v1345_v26, %v1341_v20  ;;  %v2276_v57 = vunpack.i.h.bf16 %v2274_v48  ;;  %v2275_v38 = vunpack.i.l.bf16 %v2274_v48 }
 0x58d   : > { %v1375_v62 = vmul.f32 %v3047_v19, %v1346_v30  ;;  %2065 = vmatmul.msk.bf16.vlgmr.msra.gmra.mxu2 %vm992_vm15, %v1565_v32  ;;  %v1392_v1 = vpack.c.bf16 %v1376_v46, %v1376_v46  ;;  %v1369_v12 = vmul.f32 %v3007_v40, %v1262_v18  ;;  %v1302_v61 = vand.u32 2147483648, %v3120_v23  ;;  %v1418_v30 = vpop.f32.mrf.mxu0 }
 0x58e   : > { %v718_v50 = vpack.c.bf16 %v2276_v57, %v2276_v57  ;;  %v717_v55 = vpack.c.bf16 %v2275_v38, %v2275_v38  ;;  %v1370_v8 = vmul.f32 %v3012_v58, %v1276_v59  ;;  %v1295_v56 = vadd.f32 %v3164_v51, %v1294_v43 }
 0x58f   : > { %v1391_v44 = vpack.c.bf16 %v1375_v62, %v1375_v62  ;;  %vm1297_vm3 = vweird.f32 %v3164_v51  ;;  %vm1296_vm11 = vweird.f32 %v3120_v23  ;;  %vm3255_vm13 = vcmp.eq.f32.partialorder %v1300_v31, 8.507059e+37 }
 0x590   : > { %v1597_v19 = vunpack.c.l.b16 %v718_v50  ;;  %v1596_v14 = vunpack.c.l.b16 %v717_v55  ;;  %v1592_v40 = vunpack.c.l.b16 %v1392_v1  ;;  %v1385_v52 = vpack.c.bf16 %v1369_v12, %v1369_v12  ;;  %vm3260_vm4 = vmor %vm1296_vm11, %vm1297_vm3  ;;  %v1634_v12 = vld [vmem:[#allocation8 + $0x4] sm:$0xf] }
 0x591   : > { %v1591_v22 = vunpack.c.l.b16 %v1391_v44  ;;  %v1386_v6 = vpack.c.bf16 %v1370_v8, %v1370_v8  ;;  %v1299_v23 = vsel %vm3260_vm4, %v3164_v51, %v1295_v56  ;;  %v1303_v13 = vor.u32 1.1754944e-38, %v1302_v61  ;;  %v1635_v44 = vld [vmem:[#allocation8 + $0x8] sm:$0xf] }
 0x592   : > { %v2364_v45 = vpop.eup %2363  ;;  %v1598_v24 = vpack.c.b16 %v1597_v19, %v1596_v14  ;;  %v1288_v25 = vand.u32 2147483648, %v3235_v2  ;;  %vm1649_vm2 = vcmask 1043456   ;;  %v1286_v28 = vand.u32 2147483647, %v3235_v2 }
 0x593   : > { %v1278_v60 = vmul.f32 %v2364_v45, %v3235_v2  ;;  %v2279_v17 = vpop.permute.xlu0 %2278  ;;  %vm1283_vm6 = vweird.f32 %v2364_v45  ;;  %v1593_v29 = vpack.c.b16 %v1592_v40, %v1591_v22  ;;  %v1304_v35 = vsel %vm3255_vm13, %v1303_v13, %v1299_v23  ;;  %v1639_v23 = vld [vmem:[#allocation8 + $0x18] sm:$0xf] }
 0x594   : > { %v2281_v41 = vunpack.i.h.bf16 %v2279_v17  ;;  %v2280_v54 = vunpack.i.l.bf16 %v2279_v17  ;;  %1610 = vmatpush.bf16.msra.mxu3 %v1598_v24  ;;  %v1508_v37 = vunpack.c.l.b16 %v1386_v6  ;;  %vm1282_vm7 = vweird.f32 %v3235_v2 }
 0x595   : > { %v1279_v39 = vsub.f32 1.0, %v1278_v60  ;;  %vm1284_vm1 = vmor %vm1282_vm7, %vm1283_vm6  ;;  %v1289_v42 = vor.u32 1.1754944e-38, %v1288_v25  ;;  %v1651_v9 = vsel %vm1649_vm2, %v1633_v34, 0  ;;  %v1507_v10 = vunpack.c.l.b16 %v1385_v52  ;;  %v1636_v60 = vld [vmem:[#allocation8 + $0xc] sm:$0xf] }
 0x596   : > { %v712_v49 = vpack.c.bf16 %v2281_v41, %v2281_v41  ;;  %v711_v5 = vpack.c.bf16 %v2280_v54, %v2280_v54  ;;  %v1372_v16 = vmul.f32 %v3018_v11, %v1304_v35  ;;  %vm1287_vm5 = vcmp.eq.f32.partialorder %v1286_v28, 8.507059e+37  ;;  %v1637_v25 = vld [vmem:[#allocation8 + $0x10] sm:$0xf]  ;;  %v1638_v34 = vld [vmem:[#allocation8 + $0x14] sm:$0xf] }
 0x597   : > { %v1280_v27 = vmul.f32 %v2364_v45, %v1279_v39  ;;  %2066 = vmatmul.msk.bf16.vlgmr.msra.gmra.mxu3 %vm992_vm15, %v1593_v29  ;;  %v1509_v2 = vpack.c.b16 %v1508_v37, %v1507_v10  ;;  %v1618_v62 = vpack.c.bf16 %v1418_v30, %v1418_v30  ;;  %v1617_v31 = vpack.c.bf16 %v1416_v0, %v1416_v0  ;;  %v1640_v39 = vld [vmem:[#allocation8 + $0x1c] sm:$0xf] }
 0x598   : > { %v1513_v4 = vunpack.c.l.b16 %v712_v49  ;;  %v1512_v51 = vunpack.c.l.b16 %v711_v5  ;;  %v1388_v20 = vpack.c.bf16 %v1372_v16, %v1372_v16  ;;  %v1676_v61 = vsel %vm1649_vm2, %v1634_v12, 0 }
 0x599   : > { %v1281_v53 = vadd.f32 %v2364_v45, %v1280_v27  ;;  %v1643_v1 = vunpack.c.l.b16 %v1617_v31  ;;  %v1701_v55 = vsel %vm1649_vm2, %v1635_v44, 0  ;;  %v1726_v17 = vsel %vm1649_vm2, %v1636_v60, 0 }
 0x59a   : > { %v1514_v33 = vpack.c.b16 %v1513_v4, %v1512_v51  ;;  %v1536_v59 = vunpack.c.l.b16 %v1388_v20  ;;  %1710 = vmatpush.bf16.msrb.mxu2 %v1701_v55  ;;  %1735 = vmatpush.bf16.msrb.mxu3 %v1726_v17  ;;  %v1801_v13 = vsel %vm1649_vm2, %v1639_v23, 0  ;;  %v1826_v49 = vsel %vm1649_vm2, %v1640_v39, 0 }
 0x59b   : > { %v1285_v36 = vsel %vm1284_vm1, %v2364_v45, %v1281_v53  ;;  %v2284_v47 = vpop.permute.xlu0 %2283  ;;  %v1751_v5 = vsel %vm1649_vm2, %v1637_v25, 0  ;;  %v1776_v0 = vsel %vm1649_vm2, %v1638_v34, 0 }
 0x59c   : > { %v1290_v63 = vsel %vm1287_vm5, %v1289_v42, %v1285_v36  ;;  %v2286_v3 = vunpack.i.h.bf16 %v2284_v47  ;;  %v2285_v15 = vunpack.i.l.bf16 %v2284_v47  ;;  %1526 = vmatpush.bf16.msrb.mxu0 %v1514_v33 }
 0x59d   : > { %v1371_v26 = vmul.f32 %v3057_v7, %v1290_v63  ;;  %v1644_v7 = vunpack.c.l.b16 %v1618_v62 }
 0x59e   : > { %v714_v48 = vpack.c.bf16 %v2286_v3, %v2286_v3  ;;  %v713_v46 = vpack.c.bf16 %v2285_v15, %v2285_v15  ;;  %1810 = vmatpush.bf16.msra.mxu2 %v1801_v13  ;;  %1835 = vmatpush.bf16.msra.mxu3 %v1826_v49 }
 0x59f   : > { %v1387_v32 = vpack.c.bf16 %v1371_v26, %v1371_v26  ;;  %2063 = vmatmul.msk.bf16.vlgmr.msrb.gmra.mxu0 %vm992_vm15, %v1509_v2  ;;  %v1645_v50 = vpack.c.b16 %v1644_v7, %v1643_v1 }
 0x5a0   : > { %1660 = vmatpush.bf16.msra.mxu0 %v1651_v9  ;;  %v1541_v18 = vunpack.c.l.b16 %v714_v48  ;;  %v1540_v43 = vunpack.c.l.b16 %v713_v46 }
 0x5a1   : > { %v1535_v11 = vunpack.c.l.b16 %v1387_v32 }
 0x5a2   : > { %v1542_v57 = vpack.c.b16 %v1541_v18, %v1540_v43 }
 0x5a3   : > { %v1537_v38 = vpack.c.b16 %v1536_v59, %v1535_v11 }
 0x5a4   : > { %1554 = vmatpush.bf16.msrb.mxu1 %v1542_v57  ;;  %1760 = vmatpush.bf16.msrb.mxu0 %v1751_v5 }
 0x5a7   : > { %2064 = vmatmul.msk.bf16.vlgmr.msrb.gmra.mxu1 %vm992_vm15, %v1537_v38 }
 0x5a8   : > { %1685 = vmatpush.bf16.msra.mxu1 %v1676_v61 }
 0x5ac   : > { %1785 = vmatpush.bf16.msrb.mxu1 %v1776_v0  ;;  %v2365_v0 = vld [vmem:[#allocation7] sm:$0xff] }
 0x5af   : > { %2067 = vmatmul.msk.bf16.vlgmr.msra.gmra.mxu0 %vm731_vm14, %v1645_v50 }
 0x5e0   : > { %v1444_v8 = vpop.f32.mrf.mxu1 }
 0x5e1   : > { %v1619_v56 = vpack.c.bf16 %v1444_v8, %v1444_v8 }
 0x5e3   : > { %v1669_v14 = vunpack.c.l.b16 %v1619_v56 }
 0x5e8   : > { %v1446_v19 = vpop.f32.mrf.mxu1 }
 0x5e9   : > { %v1620_v45 = vpack.c.bf16 %v1446_v19, %v1446_v19 }
 0x5eb   : > { %v1670_v21 = vunpack.c.l.b16 %v1620_v45 }
 0x5ed   : > { %v1671_v40 = vpack.c.b16 %v1670_v21, %v1669_v14 }
 0x5ef   : > { %2068 = vmatmul.msk.bf16.vlgmr.msra.gmra.mxu1 %vm731_vm14, %v1671_v40  ;;  %v1472_v22 = vpop.f32.mrf.mxu2 }
 0x5f0   : > { %v1621_v52 = vpack.c.bf16 %v1472_v22, %v1472_v22 }
 0x5f2   : > { %v1694_v41 = vunpack.c.l.b16 %v1621_v52 }
 0x5f7   : > { %v1474_v58 = vpop.f32.mrf.mxu2 }
 0x5f8   : > { %v1622_v24 = vpack.c.bf16 %v1474_v58, %v1474_v58 }
 0x5fa   : > { %v1695_v54 = vunpack.c.l.b16 %v1622_v24 }
 0x5fc   : > { %v1696_v6 = vpack.c.b16 %v1695_v54, %v1694_v41 }
 0x5fe   : > { %2069 = vmatmul.msk.bf16.vlgmr.msrb.gmra.mxu2 %vm731_vm14, %v1696_v6 }
 0x608   : > { %v1500_v27 = vpop.f32.mrf.mxu3 }
 0x609   : > { %v1623_v29 = vpack.c.bf16 %v1500_v27, %v1500_v27 }
 0x60b   : > { %v1719_v51 = vunpack.c.l.b16 %v1623_v29 }
 0x610   : > { %v1584_v28 = vpop.f32.mrf.mxu2  ;;  %v1502_v35 = vpop.f32.mrf.mxu3 }
 0x611   : > { %v1624_v4 = vpack.c.bf16 %v1502_v35, %v1502_v35  ;;  %v1629_v42 = vpack.c.bf16 %v1584_v28, %v1584_v28 }
 0x613   : > { %v1720_v37 = vunpack.c.l.b16 %v1624_v4  ;;  %v1794_v10 = vunpack.c.l.b16 %v1629_v42  ;;  %v1872_v4 = vperm.slane %v2365_v0, 3 }
 0x615   : > { %v1721_v53 = vpack.c.b16 %v1720_v37, %v1719_v51 }
 0x617   : > { %2070 = vmatmul.msk.bf16.vlgmr.msrb.gmra.mxu3 %vm731_vm14, %v1721_v53 }
 0x618   : > { %v1586_v33 = vpop.f32.mrf.mxu2 }
 0x619   : > { %v1630_v9 = vpack.c.bf16 %v1586_v33, %v1586_v33 }
 0x61a   : > { %v1612_v36 = vpop.f32.mrf.mxu3 }
 0x61b   : > { %v1795_v16 = vunpack.c.l.b16 %v1630_v9  ;;  %v1631_v3 = vpack.c.bf16 %v1612_v36, %v1612_v36 }
 0x61c   : > { %v1528_v47 = vpop.f32.mrf.mxu0 }
 0x61d   : > { %v1796_v63 = vpack.c.b16 %v1795_v16, %v1794_v10  ;;  %v1625_v15 = vpack.c.bf16 %v1528_v47, %v1528_v47  ;;  %v1819_v32 = vunpack.c.l.b16 %v1631_v3 }
 0x61f   : > { %2073 = vmatmul.msk.bf16.vlgmr.msra.gmra.mxu2 %vm731_vm14, %v1796_v63  ;;  %v1744_v18 = vunpack.c.l.b16 %v1625_v15 }
 0x622   : > { %v1614_v26 = vpop.f32.mrf.mxu3 }
 0x623   : > { %v1632_v48 = vpack.c.bf16 %v1614_v26, %v1614_v26 }
 0x624   : > { %v1530_v2 = vpop.f32.mrf.mxu0  ;;  %v1556_v20 = vpop.f32.mrf.mxu1 }
 0x625   : > { %v1626_v46 = vpack.c.bf16 %v1530_v2, %v1530_v2  ;;  %v1820_v43 = vunpack.c.l.b16 %v1632_v48  ;;  %v1627_v59 = vpack.c.bf16 %v1556_v20, %v1556_v20 }
 0x627   : > { %v1745_v11 = vunpack.c.l.b16 %v1626_v46  ;;  %v1821_v30 = vpack.c.b16 %v1820_v43, %v1819_v32  ;;  %v1769_v31 = vunpack.c.l.b16 %v1627_v59 }
 0x629   : > { %v1746_v57 = vpack.c.b16 %v1745_v11, %v1744_v18  ;;  %2074 = vmatmul.msk.bf16.vlgmr.msra.gmra.mxu3 %vm731_vm14, %v1821_v30 }
 0x62b   : > { %2071 = vmatmul.msk.bf16.vlgmr.msrb.gmra.mxu0 %vm731_vm14, %v1746_v57 }
 0x62c   : > { %v1558_v62 = vpop.f32.mrf.mxu1  ;;  %v1662_v50 = vpop.f32.mrf.mxu0 }
 0x62d   : > { %v1628_v38 = vpack.c.bf16 %v1558_v62, %v1558_v62  ;;  %v1842_v21 = vsel %vm330_vm0, %v1662_v50, 0.0 }
 0x62f   : > { %v1770_v7 = vunpack.c.l.b16 %v1628_v38 }
 0x631   : > { %v1771_v1 = vpack.c.b16 %v1770_v7, %v1769_v31 }
 0x633   : > { %2072 = vmatmul.msk.bf16.vlgmr.msrb.gmra.mxu1 %vm731_vm14, %v1771_v1  ;;  %vm1877_vm14 = vcmask 519168  }
 0x634   : > { %v1664_v55 = vpop.f32.mrf.mxu0 }
 0x635   : > { %v1857_v13 = vsel %vm330_vm0, %v1664_v55, 0.0 }
 0x66c   : > { %v1687_v61 = vpop.f32.mrf.mxu1 }
 0x66d   : > { %v1843_v56 = vsel %vm330_vm0, %v1687_v61, 0.0 }
 0x66e   : > { %v1844_v22 = vadd.f32 %v1843_v56, %v1842_v21 }
 0x674   : > { %v1689_v19 = vpop.f32.mrf.mxu1 }
 0x675   : > { %v1858_v41 = vsel %vm330_vm0, %v1689_v19, 0.0 }
 0x676   : > { %v1859_v49 = vadd.f32 %v1858_v41, %v1857_v13 }
 0x681   : > { %v1712_v12 = vpop.f32.mrf.mxu2 }
 0x682   : > { %v1845_v40 = vsel %vm330_vm0, %v1712_v12, 0.0 }
 0x683   : > { %v1846_v17 = vadd.f32 %v1845_v40, %v1844_v22 }
 0x689   : > { %v1714_v8 = vpop.f32.mrf.mxu2 }
 0x68a   : > { %v1860_v39 = vsel %vm330_vm0, %v1714_v8, 0.0 }
 0x68b   : > { %v1861_v34 = vadd.f32 %v1860_v39, %v1859_v49 }
 0x69a   : > { %v1737_v44 = vpop.f32.mrf.mxu3 }
 0x69b   : > { %v1847_v60 = vsel %vm330_vm0, %v1737_v44, 0.0 }
 0x69c   : > { %v1848_v58 = vadd.f32 %v1847_v60, %v1846_v17 }
 0x6a2   : > { %v1739_v45 = vpop.f32.mrf.mxu3  ;;  %v1812_v24 = vpop.f32.mrf.mxu2 }
 0x6a3   : > { %v1862_v28 = vsel %vm330_vm0, %v1739_v45, 0.0  ;;  %v1853_v29 = vsel %vm330_vm0, %v1812_v24, 0.0 }
 0x6a4   : > { %v1863_v53 = vadd.f32 %v1862_v28, %v1861_v34 }
 0x6a8   : > { %v1762_v14 = vpop.f32.mrf.mxu0 }
 0x6a9   : > { %v1849_v52 = vsel %vm330_vm0, %v1762_v14, 0.0 }
 0x6aa   : > { %v1850_v54 = vadd.f32 %v1849_v52, %v1848_v58  ;;  %v1814_v33 = vpop.f32.mrf.mxu2 }
 0x6ab   : > { %v1868_v15 = vsel %vm330_vm0, %v1814_v33, 0.0 }
 0x6ac   : > { %v1837_v6 = vpop.f32.mrf.mxu3 }
 0x6ad   : > { %v1855_v51 = vsel %vm330_vm0, %v1837_v6, 0.0 }
 0x6b0   : > { %v1787_v23 = vpop.f32.mrf.mxu1  ;;  %v1764_v5 = vpop.f32.mrf.mxu0 }
 0x6b1   : > { %v1851_v25 = vsel %vm330_vm0, %v1787_v23, 0.0  ;;  %v1864_v37 = vsel %vm330_vm0, %v1764_v5, 0.0 }
 0x6b2   : > { %v1852_v27 = vadd.f32 %v1851_v25, %v1850_v54  ;;  %v1865_v9 = vadd.f32 %v1864_v37, %v1863_v53 }
 0x6b4   : > { %v1854_v35 = vadd.f32 %v1853_v29, %v1852_v27  ;;  %v1839_v63 = vpop.f32.mrf.mxu3 }
 0x6b5   : > { %v1870_v2 = vsel %vm330_vm0, %v1839_v63, 0.0 }
 0x6b6   : > { %v1856_v42 = vadd.f32 %v1855_v51, %v1854_v35 }
 0x6b8   : > { %v1873_v10 = vadd.f32 %v1872_v4, %v1856_v42  ;;  %v1789_v16 = vpop.f32.mrf.mxu1 }
 0x6b9   : > { %v1866_v36 = vsel %vm330_vm0, %v1789_v16, 0.0 }
 0x6ba   : > { %v1875_v47 = vpack.c.bf16 %v1873_v10, %v1873_v10  ;;  %v1867_v3 = vadd.f32 %v1866_v36, %v1865_v9 }
 0x6bc   : > { %v1869_v26 = vadd.f32 %v1868_v15, %v1867_v3  ;;  %1878 = vst.msk [vmem:[%s265_s8] sm:$0xf] %vm1877_vm14, %v1875_v47 }
 0x6be   : > { %v1871_v48 = vadd.f32 %v1870_v2, %v1869_v26 }
 0x6c0   : > { %v1874_v46 = vadd.f32 %v1872_v4, %v1871_v48 }
 0x6c2   : > { %v1876_v20 = vpack.c.bf16 %v1874_v46, %v1874_v46 }
 0x6c4   : > { %1879 = vst.msk [vmem:[%s265_s8 + $0x4] sm:$0xf] %vm1877_vm14, %v1876_v20 }
 0x6c5   : > { %2513 = shalt.err (!%p2510_p10)
}
 0x6c6   : > { %s2578_s29 = smov 4  }
 0x6c7   : > { %2105 = dma.vmem_to_hbm [thread:$0]  (%p2689_p3), %s1894_s19, 128, %s1896_s27, %s1881_s28, %s2569_s21, %s2569_s21, %s2578_s29  }
 0x6c8 PF: > { %s1910_s20 = sand.u32 1, %s2548_s15   ;;  %p3373_p12 = scmp.ge.s32.totalorder %s2560_s18, 2 }
 0x6c9   : > { %s1911_s6 = scalar_lea.sflag [#allocation4], %s1910_s20 }
 0x6ca   : > { %p2122_p13 = pnand %p3373_p12, %p2639_p6 }
 0x6cc   : > { %p2123_p0 = pneg %p2122_p13 }
 0x6ce   : > { %2543 = dma.done.wait (%p2123_p0), %s1911_s6, 128  }
 0x6cf   : > { %2545 = vsyncadd (%p2123_p0), %s1911_s6, 4294967168  ;;  %p19_p5 = scmp.ge.s32.totalorder %s2676_s25, 4   ;;  %s3374_s15 = smov %s2552_s16 }
 0x6d0   : > { %s3375_s16 = smov %s2556_s17  ;;  %s3376_s17 = smov %s2685_s30 }
 0x6d1   : > { %s3377_s18 = smov %s2676_s25  ;;  %21 = sbr.rel (!%p19_p5) target bundleno = 7 (0x7), region = 93 }
 0x6d6   :  { %1917 = vsyncpa [#allocation3], 1 }
 0x6d7   :  { %1919 = vsyncpa [#allocation3 + $0x1], 1 }
 0x6d8   :  { %1920 = vsyncpa [#allocation6], 1 }
 0x6d9   :  { %1921 = vsyncpa [#allocation9], 1 }
 0x6da   :  { %1922 = vsyncpa [#allocation4], 1 }
 0x6db   :  { %1924 = vsyncpa [#allocation4 + $0x1], 1 }

</bundles_post_ra>
